<compile_context>
chip_gen: v5e
topology: v5e:2x2
jax: 0.10.0
libtpu: 0.0.40
codegen_flags: <defaults>
</compile_context>

<pallas_src>
import functools

import jax
import jax.numpy as jnp
import numpy as np
from jax.experimental import pallas as pl
from jax.experimental.pallas import tpu as pltpu


# ----------------------------------------------------------------------------
# tiling helpers
# ----------------------------------------------------------------------------
def _round_up(x, m):
    return (x + m - 1) // m * m


def _tile_rows(n, bytes_per_row, max_tm=512, vmem_budget=12 << 20):
    """Pick a row tile (multiple of 8) and grid so tiles fit VMEM comfortably.

    bytes_per_row ~= per-row input + output bytes; budget assumes double
    buffering of both sides (2 bufs each), which keeps us well under the
    scoped VMEM limit on v5e/v6e/v7x.
    """
    n8 = _round_up(n, 8)
    cap = max(8, (vmem_budget // max(1, 4 * bytes_per_row)) // 8 * 8)
    max_tm = max(8, min(max_tm, cap))
    grid = -(-n8 // max_tm)
    tm = _round_up(-(-n8 // grid), 8)      # spread rows evenly over the grid
    return tm, grid, tm * grid


def _pad_rows(x, n_pad):
    n = x.shape[0]
    if n_pad == n:
        return x
    return jnp.pad(x, ((0, n_pad - n), (0, 0)))


# ----------------------------------------------------------------------------
# aggregation == 'concat':  X = Linear(concat(Xs, -1))
#   fused: out = sum_l Xs[l] @ W[off_l : off_l + H_l, :]  + b
# ----------------------------------------------------------------------------
def _concat_linear_kernel(widths, *refs):
    nl = len(widths)
    xs_refs = refs[:nl]
    w_ref, b_ref = refs[nl], refs[nl + 1]
    o_ref = refs[nl + 2]

    acc = None
    off = 0
    for x_ref, h in zip(xs_refs, widths):
        part = jnp.dot(x_ref[...], w_ref[off:off + h, :],
                       preferred_element_type=jnp.float32)
        acc = part if acc is None else acc + part
        off += h
    o_ref[...] = (acc + b_ref[...].astype(jnp.float32)).astype(o_ref.dtype)


def dense_concat(xs_list, w, b, *, max_tm=512):
    n = xs_list[0].shape[0]
    widths = tuple(int(x.shape[1]) for x in xs_list)
    in_dim = sum(widths)
    out_dim = w.shape[1]
    dtype = xs_list[0].dtype
    itemsize = jnp.dtype(dtype).itemsize

    tm, grid, n_pad = _tile_rows(n, (in_dim + out_dim) * itemsize, max_tm)
    xs_p = [_pad_rows(x, n_pad) for x in xs_list]

    in_specs = [pl.BlockSpec((tm, h), lambda i: (i, 0)) for h in widths]
    in_specs += [
        pl.BlockSpec((in_dim, out_dim), lambda i: (0, 0)),   # resident weight
        pl.BlockSpec((1, out_dim), lambda i: (0, 0)),        # resident bias
    ]

    out = pl.pallas_call(
        functools.partial(_concat_linear_kernel, widths),
        out_shape=jax.ShapeDtypeStruct((n_pad, out_dim), dtype),
        grid=(grid,),
        in_specs=in_specs,
        out_specs=pl.BlockSpec((tm, out_dim), lambda i: (i, 0)),
        compiler_params=pltpu.CompilerParams(dimension_semantics=("parallel",)),
    )(*xs_p, w, b.reshape(1, -1))
    return out[:n], xs_list


# ----------------------------------------------------------------------------
# aggregation == 'maxpool':  X = max over layers (elementwise, no stack in HBM)
# ----------------------------------------------------------------------------
def _maxpool_kernel(num_layers, *refs):
    xs_refs = refs[:num_layers]
    o_ref = refs[num_layers]
    acc = xs_refs[0][...]
    for r in xs_refs[1:]:
        acc = jnp.maximum(acc, r[...])
    o_ref[...] = acc


def dense_maxpool(xs_list, *, max_tm=512):
    n, h = xs_list[0].shape
    nl = len(xs_list)
    dtype = xs_list[0].dtype
    itemsize = jnp.dtype(dtype).itemsize

    tm, grid, n_pad = _tile_rows(n, (nl + 1) * h * itemsize, max_tm)
    xs_p = [_pad_rows(x, n_pad) for x in xs_list]

    out = pl.pallas_call(
        functools.partial(_maxpool_kernel, nl),
        out_shape=jax.ShapeDtypeStruct((n_pad, h), dtype),
        grid=(grid,),
        in_specs=[pl.BlockSpec((tm, h), lambda i: (i, 0)) for _ in range(nl)],
        out_specs=pl.BlockSpec((tm, h), lambda i: (i, 0)),
        compiler_params=pltpu.CompilerParams(dimension_semantics=("parallel",)),
    )(*xs_p)
    return out[:n], xs_list


# ----------------------------------------------------------------------------
# aggregation == 'attention':
#   score_l = sigmoid(Xs[l] @ w_att + b);   X = sum_l score_l * Xs[l]
#   logit via VPU multiply + lane reduce (no 1-column MXU matmul);
#   per-layer contribution multiplied in input dtype, accumulated in f32.
# ----------------------------------------------------------------------------
def _attention_kernel(num_layers, *refs):
    xs_refs = refs[:num_layers]
    w_ref, b_ref = refs[num_layers], refs[num_layers + 1]
    o_ref = refs[num_layers + 2]

    acc = jnp.zeros(o_ref.shape, jnp.float32)
    for x_ref in xs_refs:
        x = x_ref[...]                                    # [tm, H]
        w_row = w_ref[...].astype(x.dtype)                # [1, H]
        s = jnp.sum((x * w_row).astype(jnp.float32),
                    axis=-1, keepdims=True)               # [tm, 1] lane reduce
        score = jax.nn.sigmoid(s + b_ref[...])            # [tm, 1]
        acc = acc + (score.astype(x.dtype) * x).astype(jnp.float32)
    o_ref[...] = acc.astype(o_ref.dtype)


def dense_attention(xs_list, w_att, b_att, *, max_tm=512):
    n, h = xs_list[0].shape
    nl = len(xs_list)
    dtype = xs_list[0].dtype
    itemsize = jnp.dtype(dtype).itemsize

    tm, grid, n_pad = _tile_rows(n, (nl + 1) * h * itemsize, max_tm)
    xs_p = [_pad_rows(x, n_pad) for x in xs_list]

    w_row = w_att.reshape(1, h)
    b_val = b_att.reshape(1, 1).astype(jnp.float32)

    in_specs = [pl.BlockSpec((tm, h), lambda i: (i, 0)) for _ in range(nl)]
    in_specs += [
        pl.BlockSpec((1, h), lambda i: (0, 0)),           # resident att weight
        pl.BlockSpec((1, 1), lambda i: (0, 0)),           # resident att bias
    ]

    out = pl.pallas_call(
        functools.partial(_attention_kernel, nl),
        out_shape=jax.ShapeDtypeStruct((n_pad, h), dtype),
        grid=(grid,),
        in_specs=in_specs,
        out_specs=pl.BlockSpec((tm, h), lambda i: (i, 0)),
        compiler_params=pltpu.CompilerParams(dimension_semantics=("parallel",)),
    )(*xs_p, w_row, b_val)
    return out[:n], xs_list


# ----------------------------------------------------------------------------
# pure-JAX references (mirror the PyTorch forward exactly)
# ----------------------------------------------------------------------------
def ref_concat(xs_list, w, b):
    return jnp.concatenate(xs_list, axis=-1) @ w + b


def ref_maxpool(xs_list):
    return jnp.max(jnp.stack(xs_list, axis=-1), axis=-1)


def ref_attention(xs_list, w_att, b_att):
    pps = jnp.stack(xs_list, axis=1)                              # [N, L, H]
    retain = jax.nn.sigmoid(jnp.squeeze(pps @ w_att + b_att, -1))  # [N, L]
    return jnp.einsum("nl,nlh->nh", retain, pps)


if __name__ == "__main__":
    # L=3 hidden layers of width H=128 (lane-dense outputs), N=1203 nodes
    # (non-multiple of 8/tile -> exercises pad + slice and a multi-step grid),
    # in_dim = L*H = 384, out_dim = 128.
    L, N, H = 3, 1203, 128
    in_dim, out_dim = L * H, H

    key = jax.random.PRNGKey(0)
    k_xs, k_w, k_b, k_wa, k_ba = jax.random.split(key, 5)

    xs_list = [
        jax.random.normal(k, (N, H), dtype=jnp.float32)
        for k in jax.random.split(k_xs, L)
    ]

    # nn.Linear-shaped parameters (deterministic).
    w_transform = jax.random.normal(k_w, (in_dim, out_dim), jnp.float32) * 0.05
    b_transform = jax.random.normal(k_b, (out_dim,), jnp.float32) * 0.05
    w_att = jax.random.normal(k_wa, (H, 1), jnp.float32) * 0.05
    b_att = jax.random.normal(k_ba, (1,), jnp.float32) * 0.05

    # concat
    out_c, _ = dense_concat(xs_list, w_transform, b_transform)
    out_c = jax.block_until_ready(out_c)
    np.testing.assert_allclose(
        np.asarray(out_c), np.asarray(ref_concat(xs_list, w_transform, b_transform)),
        rtol=1e-5, atol=1e-5)

    # maxpool
    out_m, _ = dense_maxpool(xs_list)
    out_m = jax.block_until_ready(out_m)
    np.testing.assert_allclose(
        np.asarray(out_m), np.asarray(ref_maxpool(xs_list)), rtol=1e-6, atol=1e-6)

    # attention
    out_a, _ = dense_attention(xs_list, w_att, b_att)
    out_a = jax.block_until_ready(out_a)
    np.testing.assert_allclose(
        np.asarray(out_a), np.asarray(ref_attention(xs_list, w_att, b_att)),
        rtol=1e-5, atol=1e-5)

    print("KERNEL_OK")
</pallas_src>

<mosaic_0001>
module attributes {stable_mosaic.version = 11 : i64} {
  func.func @_concat_linear_kernel(%arg0: i32, %arg1: memref<408x128xf32, #tpu.memory_space<vmem>>, %arg2: memref<408x128xf32, #tpu.memory_space<vmem>>, %arg3: memref<408x128xf32, #tpu.memory_space<vmem>>, %arg4: memref<384x128xf32, #tpu.memory_space<vmem>>, %arg5: memref<1x128xf32, #tpu.memory_space<vmem>>, %arg6: memref<408x128xf32, #tpu.memory_space<vmem>>) attributes {dimension_semantics = [#tpu.dimension_semantics<parallel>], iteration_bounds = array<i64: 3>, scalar_prefetch = 0 : i64, scratch_operands = 0 : i64, tpu.core_type = #tpu.core_type<tc>, window_params = [{transform_indices = @transform_0, window_bounds = array<i64: 408, 128>}, {transform_indices = @transform_1, window_bounds = array<i64: 408, 128>}, {transform_indices = @transform_2, window_bounds = array<i64: 408, 128>}, {pipeline_mode = #tpu.pipeline_mode<synchronous>, transform_indices = @transform_3, window_bounds = array<i64: 384, 128>}, {pipeline_mode = #tpu.pipeline_mode<synchronous>, transform_indices = @transform_4, window_bounds = array<i64: 1, 128>}, {transform_indices = @transform_5, window_bounds = array<i64: 408, 128>}]} {
    %c0 = arith.constant 0 : index
    %c0_0 = arith.constant 0 : index
    %0 = vector.load %arg1[%c0, %c0_0] : memref<408x128xf32, #tpu.memory_space<vmem>>, vector<408x128xf32>
    %c0_1 = arith.constant 0 : index
    %c0_2 = arith.constant 0 : index
    %1 = vector.load %arg4[%c0_1, %c0_2] : memref<384x128xf32, #tpu.memory_space<vmem>>, vector<128x128xf32>
    %cst = arith.constant dense<0.000000e+00> : vector<408x128xf32>
    %2 = tpu.matmul %0, %1, %cst {dimension_numbers = #tpu.dot_dimension_numbers<[1], [0], [0], [1], [0, 0, 1, 1], [], []>} : vector<408x128xf32>, vector<128x128xf32>, vector<408x128xf32> -> vector<408x128xf32>
    %c0_3 = arith.constant 0 : index
    %c0_4 = arith.constant 0 : index
    %3 = vector.load %arg2[%c0_3, %c0_4] : memref<408x128xf32, #tpu.memory_space<vmem>>, vector<408x128xf32>
    %c128 = arith.constant 128 : index
    %c0_5 = arith.constant 0 : index
    %4 = vector.load %arg4[%c128, %c0_5] : memref<384x128xf32, #tpu.memory_space<vmem>>, vector<128x128xf32>
    %cst_6 = arith.constant dense<0.000000e+00> : vector<408x128xf32>
    %5 = tpu.matmul %3, %4, %cst_6 {dimension_numbers = #tpu.dot_dimension_numbers<[1], [0], [0], [1], [0, 0, 1, 1], [], []>} : vector<408x128xf32>, vector<128x128xf32>, vector<408x128xf32> -> vector<408x128xf32>
    %6 = arith.addf %2, %5 : vector<408x128xf32>
    %c0_7 = arith.constant 0 : index
    %c0_8 = arith.constant 0 : index
    %7 = vector.load %arg3[%c0_7, %c0_8] : memref<408x128xf32, #tpu.memory_space<vmem>>, vector<408x128xf32>
    %c256 = arith.constant 256 : index
    %c0_9 = arith.constant 0 : index
    %8 = vector.load %arg4[%c256, %c0_9] : memref<384x128xf32, #tpu.memory_space<vmem>>, vector<128x128xf32>
    %cst_10 = arith.constant dense<0.000000e+00> : vector<408x128xf32>
    %9 = tpu.matmul %7, %8, %cst_10 {dimension_numbers = #tpu.dot_dimension_numbers<[1], [0], [0], [1], [0, 0, 1, 1], [], []>} : vector<408x128xf32>, vector<128x128xf32>, vector<408x128xf32> -> vector<408x128xf32>
    %10 = arith.addf %6, %9 : vector<408x128xf32>
    %c0_11 = arith.constant 0 : index
    %c0_12 = arith.constant 0 : index
    %11 = vector.load %arg5[%c0_11, %c0_12] : memref<1x128xf32, #tpu.memory_space<vmem>>, vector<1x128xf32>
    %12 = vector.broadcast %11 : vector<1x128xf32> to vector<408x128xf32>
    %13 = arith.addf %10, %12 : vector<408x128xf32>
    %c0_13 = arith.constant 0 : index
    %c0_14 = arith.constant 0 : index
    %14 = vector.load %arg6[%c0_13, %c0_14] : memref<408x128xf32, #tpu.memory_space<vmem>>, vector<408x128xf32>
    tpu.vector_store %arg6[%c0_13, %c0_14], %13 {strides = array<i32>} : memref<408x128xf32, #tpu.memory_space<vmem>>, vector<408x128xf32>,
    return
  }
  func.func @transform_0(%arg0: i32) -> (i32, i32) {
    %c0_i32 = arith.constant 0 : i32
    %c0_i32_0 = arith.constant 0 : i32
    return %arg0, %c0_i32 : i32, i32
  }
  func.func @transform_1(%arg0: i32) -> (i32, i32) {
    %c0_i32 = arith.constant 0 : i32
    %c0_i32_0 = arith.constant 0 : i32
    return %arg0, %c0_i32 : i32, i32
  }
  func.func @transform_2(%arg0: i32) -> (i32, i32) {
    %c0_i32 = arith.constant 0 : i32
    %c0_i32_0 = arith.constant 0 : i32
    return %arg0, %c0_i32 : i32, i32
  }
  func.func @transform_3(%arg0: i32) -> (i32, i32) {
    %c0_i32 = arith.constant 0 : i32
    %c0_i32_0 = arith.constant 0 : i32
    %c0_i32_1 = arith.constant 0 : i32
    return %c0_i32, %c0_i32_0 : i32, i32
  }
  func.func @transform_4(%arg0: i32) -> (i32, i32) {
    %c0_i32 = arith.constant 0 : i32
    %c0_i32_0 = arith.constant 0 : i32
    %c0_i32_1 = arith.constant 0 : i32
    return %c0_i32, %c0_i32_0 : i32, i32
  }
  func.func @transform_5(%arg0: i32) -> (i32, i32) {
    %c0_i32 = arith.constant 0 : i32
    %c0_i32_0 = arith.constant 0 : i32
    return %arg0, %c0_i32 : i32, i32
  }
}

</mosaic_0001>

<bundles_post_ra>
// kernel: tpu_custom_call.1
= control target key start
LH: loop header
LB: loop body
LE: loop exit
PB: predicated region body
PF: predicated region fallthrough
CT: control target
= control target key end

     0   :  { %s2407_s0 = inlined_call_operand.hbm [shape: f32[1224,128], index: 0, kind: input, shape index: {}]   ;;  %s2408_s1 = inlined_call_operand.hbm [shape: f32[1224,128], index: 1, kind: input, shape index: {}]   ;;  %s2409_s2 = inlined_call_operand.hbm [shape: f32[1224,128], index: 2, kind: input, shape index: {}]   ;;  %s2410_s3 = inlined_call_operand.hbm [shape: f32[384,128], index: 3, kind: input, shape index: {}]   ;;  %s2411_s4 = inlined_call_operand.vmem [shape: f32[1,128], index: 4, kind: input, shape index: {}]   ;;  %s2412_s5 = inlined_call_operand.hbm [shape: f32[1224,128], index: 5, kind: output, shape index: {}]  }
   0x1   :  { %2419 = sst [smem:[#allocation18_spill]] %s2408_s1 }
   0x2   :  { %2420 = sst [smem:[#allocation19_spill]] %s2410_s3 }
   0x3   :  { %10 = vsyncpa [#allocation3], 0 }
   0x4   :  { %12 = vsyncpa [#allocation3 + $0x1], 0 }
   0x5   :  { %13 = vsyncpa [#allocation6], 0 }
   0x6   :  { %15 = vsyncpa [#allocation6 + $0x1], 0 }
   0x7   :  { %16 = vsyncpa [#allocation9], 0 }
   0x8   :  { %17 = vsyncpa [#allocation4], 0 }
   0x9   :  { %19 = vsyncpa [#allocation4 + $0x1], 0  ;;  %s1729_s18 = smov 0   ;;  %s1731_s19 = smov 0  }
   0xa   :  { %s1733_s20 = smov 0   ;;  %s1735_s21 = smov 0  }
   0xb LB: > { %s1750_s22 = sadd.s32 1, %s1692_s21   ;;  %s32_s23 = sadd.s32 1, %s1688_s20  ;;  %s1692_s21 = sphi %s1735_s21, %s2434_s21   ;;  %s1688_s20 = sphi %s1733_s20, %s2438_s20   ;;  %s1684_s19 = sphi %s1731_s19, %s2437_s19   ;;  %s1680_s18 = sphi %s1729_s18, %s2436_s18  }
   0xc   : > { %2421 = sst [smem:[#allocation15_spill]] %s1750_s22  ;;  %s29_s24 = ssub.s32 %s1692_s21, %s1750_s22 }
   0xd   : > { %p39_p0 = scmp.ne.s32.totalorder %s1688_s20, %s1684_s19  ;;  %p30_p1 = scmp.eq.s32.totalorder %s29_s24, 0 }
   0xe   : > { %p40_p2 = scmp.eq.s32.totalorder %s1692_s21, 0  ;;  %p1456_p4 = scmp.lt.s32.totalorder %s1692_s21, 3 }
   0xf   : > { %s1759_s25 = scalar_select %p30_p1, %s1688_s20, %s32_s23  }
  0x10   : > { %p41_p3 = por %p40_p2, %p39_p0  ;;  %s2413_s26 = sand.u32 1, %s1688_s20  }
  0x11   : > { %2422 = sst [smem:[#allocation16_spill]] %s1759_s25  ;;  %s1768_s27 = smul.u32 408, %s2413_s26 }
  0x12   : > { %s228_s28 = sand.u32 1, %s1692_s21   ;;  %s1772_s29 = smul.u32 408, %s1692_s21 }
  0x13   : > { %p1774_p5 = pnand %p1456_p4, %p41_p3  ;;  %s2424_s1 = sld [smem:[#allocation18_spill]] }
  0x14   : > { %s232_s10 = scalar_lea.vmem [#allocation5], %s1768_s27  ;;  %s1783_s12 = scalar_lea.sflag [#allocation6], %s228_s28 }
  0x15   : > { %s240_s11 = sshll.u32 %s232_s10, 4  ;;  %p1502_p7 = pneg %p1774_p5  ;;  %s241_s11 = int_to_ptr.vmem [resolvable:$true] %s240_s11 }
  0x19   : > { %s237_s8 = scalar_lea.hbm %s2424_s1, %s1772_s29  ;;  %s1505_s17 = scalar_lea.hbm %s2424_s1, 1224 }
  0x1a   : > { %s238_s9 = sshll.u32 %s237_s8, 4  ;;  %s239_s9 = int_to_ptr.hbm [resolvable:$true] %s238_s9 }
  0x1b   : > { %s1498_s13 = sshra.s32 %s239_s9, 4  ;;  %s1499_s13 = int_to_ptr.hbm [resolvable:$true] %s1498_s13 }
  0x1c   : > { %s1500_s14 = scalar_lea.hbm %s1499_s13, 408  ;;  %p1506_p10 = scmp.lt.s32.totalorder %s1499_s13, %s2424_s1 }
  0x1d   : > { %p1501_p6 = scmp.ne.s32.totalorder %s1499_s13, %s1500_s14  ;;  %p1507_p11 = scmp.lt.s32.totalorder %s1505_s17, %s1500_s14 }
  0x1f   : > { %p1503_p8 = pnand %p1502_p7, %p1501_p6  ;;  %p1508_p12 = por %p1507_p11, %p1506_p10 }
  0x21   : > { %p1504_p9 = pneg %p1503_p8 }
  0x23   : > { %p1509_p13 = pnand %p1508_p12, %p1504_p9 }
  0x25   : > { %1512 = shalt.err (!%p1509_p13)
}
  0x26   : > { %s2414_s28 = smov 128   ;;  %s1695_s6 = smov 8  }
  0x27   : > { %1447 = dma.hbm_to_vmem [thread:$0]  (!%p1774_p5), %s239_s9, 6528, %s241_s11, %s1783_s12, %s2414_s28, %s2414_s28, %s1695_s6  }
  0x28   : > { %s1803_s7 = sadd.s32 4294967295, %s1692_s21   ;;  %s1357_s8 = sadd.s32 4294967294, %s1692_s21  }
  0x29   : > { %p45_p1 = scmp.ne.s32.totalorder %s1684_s19, %s1680_s18  ;;  %p46_p2 = scmp.eq.s32.totalorder %s1803_s7, 0 }
  0x2a   : > { %p163_p3 = scmp.eq.s32.totalorder %s1803_s7, 2  ;;  %p169_p4 = scmp.eq.s32.totalorder %s1357_s8, 2 }
  0x2b   : > { %p1812_p6 = por %p46_p2, %p45_p1  ;;  %p1358_p8 = scmp.ge.s32.totalorder %s1692_s21, 1 }
  0x2c   : > { %p1820_p9 = por %p163_p3, %p39_p0  ;;  %p1824_p10 = por %p169_p4, %p45_p1 }
  0x2d   : > { %p176_p11 = scmp.lt.s32.totalorder %s1692_s21, 4  ;;  %s2429_s3 = sld [smem:[#allocation19_spill]] }
  0x2e   : > { %s2427_s11 = scalar_select %p1824_p10, 1, 0 }
  0x2f   : > { %p1832_p12 = pnand %p1358_p8, %p176_p11  ;;  %s1696_s17 = smov [#allocation8]  }
  0x30   : > { %2428 = sst [smem:[#allocation17_spill]] %s2427_s11  ;;  %s189_s23 = sshll.u32 %s1696_s17, 4  ;;  %s190_s23 = int_to_ptr.vmem [resolvable:$true] %s189_s23 }
  0x31   : > { %p1437_p0 = pneg %p1832_p12  ;;  %s215_s26 = scalar_lea.hbm %s2407_s0, %s1772_s29 }
  0x32   : > { %s216_s13 = sshll.u32 %s215_s26, 4  ;;  %s210_s14 = scalar_lea.vmem [#allocation2], %s1768_s27  ;;  %s217_s13 = int_to_ptr.hbm [resolvable:$true] %s216_s13 }
  0x33   : > { %s187_s15 = sshll.u32 %s2429_s3, 4  ;;  %p1438_p13 = pnand %p1437_p0, %p46_p2  ;;  %s188_s15 = int_to_ptr.hbm [resolvable:$true] %s187_s15 }
  0x34   : > { %s218_s28 = sshll.u32 %s210_s14, 4  ;;  %s2431_s1 = smov 128   ;;  %s219_s28 = int_to_ptr.vmem [resolvable:$true] %s218_s28 }
  0x35   : > { %1440 = dma.hbm_to_vmem [thread:$0]  (!%p1438_p13), %s188_s15, 6144, %s190_s23, [#allocation9], %s2431_s1, %s2431_s1, %s1695_s6  }
  0x36   : > { %s2432_s17 = sand.u32 1, %s1688_s20   ;;  %s1558_s25 = sshra.s32 %s217_s13, 4  ;;  %s1559_s25 = int_to_ptr.hbm [resolvable:$true] %s1558_s25 }
  0x37   : > { %s207_s3 = scalar_lea.sflag [#allocation3], %s2432_s17  ;;  %s1560_s22 = scalar_lea.hbm %s1559_s25, 408 }
  0x38   : > { %p1561_p1 = scmp.ne.s32.totalorder %s1559_s25, %s1560_s22  ;;  %s1565_s8 = scalar_lea.hbm %s2407_s0, 1224 }
  0x39   : > { %p1566_p8 = scmp.lt.s32.totalorder %s1559_s25, %s2407_s0  ;;  %p1567_p11 = scmp.lt.s32.totalorder %s1565_s8, %s1560_s22 }
  0x3a   : > { %p1563_p3 = pnand %p1561_p1, %p1502_p7 }
  0x3b   : > { %p1568_p0 = por %p1567_p11, %p1566_p8 }
  0x3c   : > { %p1564_p4 = pneg %p1563_p3 }
  0x3e   : > { %p1569_p13 = pnand %p1568_p0, %p1564_p4 }
  0x40   : > { %1572 = shalt.err (!%p1569_p13)
}
  0x41   : > { %1444 = dma.hbm_to_vmem [thread:$0]  (!%p1774_p5), %s217_s13, 6528, %s219_s28, %s207_s3, %s2431_s1, %s2431_s1, %s1695_s6  }
  0x42   : > { %s259_s17 = scalar_lea.hbm %s2409_s2, %s1772_s29  ;;  %s254_s11 = scalar_lea.vmem [#allocation7], %s1768_s27 }
  0x43   : > { %s260_s24 = sshll.u32 %s259_s17, 4  ;;  %s262_s25 = sshll.u32 %s254_s11, 4  ;;  %s261_s24 = int_to_ptr.hbm [resolvable:$true] %s260_s24  ;;  %s263_s25 = int_to_ptr.vmem [resolvable:$true] %s262_s25 }
  0x44   : > { %s1588_s22 = sshra.s32 %s261_s24, 4  ;;  %s1595_s3 = scalar_lea.hbm %s2409_s2, 1224  ;;  %s1589_s22 = int_to_ptr.hbm [resolvable:$true] %s1588_s22 }
  0x45   : > { %s1590_s26 = scalar_lea.hbm %s1589_s22, 408  ;;  %p1596_p8 = scmp.lt.s32.totalorder %s1589_s22, %s2409_s2 }
  0x46   : > { %p1591_p1 = scmp.ne.s32.totalorder %s1589_s22, %s1590_s26  ;;  %p1597_p11 = scmp.lt.s32.totalorder %s1595_s3, %s1590_s26 }
  0x48   : > { %p1593_p3 = pnand %p1591_p1, %p1502_p7  ;;  %p1598_p0 = por %p1597_p11, %p1596_p8 }
  0x4a   : > { %p1594_p4 = pneg %p1593_p3 }
  0x4c   : > { %p1599_p13 = pnand %p1598_p0, %p1594_p4 }
  0x4e   : > { %1602 = shalt.err (!%p1599_p13)
}
  0x4f   : > { %1450 = dma.hbm_to_vmem [thread:$0]  (!%p1774_p5), %s261_s24, 6528, %s263_s25, %s1783_s12, %s2431_s1, %s2431_s1, %s1695_s6  }
  0x50   : > { %274 = sbr.rel (%p1832_p12) target bundleno = 568 (0x238), region = 40  ;;  %s1887_s27 = sand.u32 (!%p1832_p12), 1, %s1684_s19  }
  0x51   : > { %s1890_s29 = smul.u32 (!%p1832_p12), 408, %s1887_s27  ;;  %s277_s15 = scalar_lea.sflag (!%p1832_p12), [#allocation3], %s1887_s27 }
  0x53   : > { %s1894_s23 = scalar_lea.vmem (!%p1832_p12), [#allocation2], %s1890_s29 }
  0x55   : > { %1663 = dma.done.wait (%p1812_p6), %s277_s15, 6528  }
  0x56   : > { %1665 = vsyncadd (%p1812_p6), %s277_s15, 4294960768  ;;  %s286_s1 = sand.u32 1, %s1803_s7   ;;  %s1902_s12 = scalar_lea.vmem [#allocation5], %s1890_s29 }
  0x57   : > { %s287_s30 = scalar_lea.sflag [#allocation6], %s286_s1 }
  0x58   : > { %1667 = dma.done.wait (%p1812_p6), %s287_s30, 13056  }
  0x59   : > { %1669 = vsyncadd (%p1812_p6), %s287_s30, 4294954240  ;;  %s1909_s6 = scalar_lea.vmem [#allocation7], %s1890_s29 }
  0x5a   : > { %1671 = dma.done.wait (%p46_p2), [#allocation9], 6144  }
  0x5b   : > { %1673 = vsyncadd (%p46_p2), [#allocation9], 4294961152  ;;  %v480_v0 = vld [vmem:[#allocation8 + $0xf8] sm:$0xff]  ;;  %v479_v2 = vld [vmem:[#allocation8 + $0xf0] sm:$0xff]  ;;  %s2120_s17 = scalar_lea.vmem [#allocation10], %s1890_s29  ;;  %s1372_s25 = smul.u32 408, %s1803_s7 }
  0x5c   : > { %v1915_v1 = vld [vmem:[#allocation8 + $0x178] sm:$0xff]  ;;  %1373 = vmatpush.msra.mxu3 %v480_v0  ;;  %v1918_v3 = vld [vmem:[#allocation8 + $0x170] sm:$0xff]  ;;  %481 = vmatpush.msra.mxu0 %v480_v0  ;;  %v478_v5 = vld [vmem:[#allocation8 + $0xe8] sm:$0xff]  ;;  %s1228_s14 = sshll.u32 %s2120_s17, 4  ;;  %s1216_s7 = scalar_lea.sflag [#allocation4], %s1887_s27  ;;  %s1229_s14 = int_to_ptr.vmem [resolvable:$true] %s1228_s14 }
  0x5d   : > { %888 = vmatpush.msra.mxu2 %v1915_v1  ;;  %v1920_v4 = vld [vmem:[#allocation8 + $0x78] sm:$0xff]  ;;  %v1923_v6 = vld [vmem:[#allocation8 + $0x168] sm:$0xff]  ;;  %v1925_v7 = vld [vmem:[#allocation8 + $0x70] sm:$0xff]  ;;  %s1227_s8 = scalar_lea.hbm %s2412_s5, %s1372_s25 }
  0x5e   : > { %651 = vmatpush.msra.mxu1 %v1920_v4  ;;  %1374 = vmatpush.msra.mxu3 %v479_v2  ;;  %v1928_v8 = vld [vmem:[#allocation8 + $0x68] sm:$0xff]  ;;  %v477_v9 = vld [vmem:[#allocation8 + $0xe0] sm:$0xff]  ;;  %v476_v12 = vld [vmem:[#allocation8 + $0xd8] sm:$0xff]  ;;  %s1230_s3 = sshll.u32 %s1227_s8, 4  ;;  %s1231_s3 = int_to_ptr.hbm [resolvable:$true] %s1230_s3 }
  0x5f   : > { %889 = vmatpush.msra.mxu2 %v1918_v3  ;;  %482 = vmatpush.msra.mxu0 %v479_v2  ;;  %v1931_v10 = vld [vmem:[#allocation8 + $0x160] sm:$0xff]  ;;  %v1937_v13 = vld [vmem:[#allocation8 + $0x158] sm:$0xff]  ;;  %v475_v15 = vld [vmem:[#allocation8 + $0xd0] sm:$0xff]  ;;  %s1632_s28 = sshra.s32 %s1231_s3, 4  ;;  %s1633_s28 = int_to_ptr.hbm [resolvable:$true] %s1632_s28 }
  0x60   : > { %652 = vmatpush.msra.mxu1 %v1925_v7  ;;  %1375 = vmatpush.msra.mxu3 %v478_v5  ;;  %v1934_v11 = vld [vmem:[#allocation8 + $0x60] sm:$0xff]  ;;  %v1940_v14 = vld [vmem:[#allocation8 + $0x58] sm:$0xff]  ;;  %v1943_v16 = vld [vmem:[#allocation8 + $0x150] sm:$0xff]  ;;  %s1634_s13 = scalar_lea.hbm %s1633_s28, 408  ;;  %p1639_p6 = scmp.lt.s32.totalorder %s1633_s28, %s2412_s5 }
  0x61   : > { %890 = vmatpush.msra.mxu2 %v1923_v6  ;;  %483 = vmatpush.msra.mxu0 %v478_v5  ;;  %v1946_v17 = vld [vmem:[#allocation8 + $0x50] sm:$0xff]  ;;  %v474_v18 = vld [vmem:[#allocation8 + $0xc8] sm:$0xff]  ;;  %v473_v21 = vld [vmem:[#allocation8 + $0xc0] sm:$0xff]  ;;  %p1635_p5 = scmp.ne.s32.totalorder %s1633_s28, %s1634_s13 }
  0x62   : > { %653 = vmatpush.msra.mxu1 %v1928_v8  ;;  %1376 = vmatpush.msra.mxu3 %v477_v9  ;;  %v1949_v19 = vld [vmem:[#allocation8 + $0x148] sm:$0xff]  ;;  %v1955_v22 = vld [vmem:[#allocation8 + $0x140] sm:$0xff]  ;;  %v472_v24 = vld [vmem:[#allocation8 + $0xb8] sm:$0xff] }
  0x63   : > { %891 = vmatpush.msra.mxu2 %v1931_v10  ;;  %484 = vmatpush.msra.mxu0 %v477_v9  ;;  %v1952_v20 = vld [vmem:[#allocation8 + $0x48] sm:$0xff]  ;;  %v1958_v23 = vld [vmem:[#allocation8 + $0x40] sm:$0xff]  ;;  %v1961_v25 = vld [vmem:[#allocation8 + $0x138] sm:$0xff]  ;;  %p1636_p7 = pnand %p1635_p5, %p1820_p9 }
  0x64   : > { %654 = vmatpush.msra.mxu1 %v1934_v11  ;;  %1377 = vmatpush.msra.mxu3 %v476_v12  ;;  %v1964_v26 = vld [vmem:[#allocation8 + $0x38] sm:$0xff]  ;;  %v471_v27 = vld [vmem:[#allocation8 + $0xb0] sm:$0xff]  ;;  %v470_v30 = vld [vmem:[#allocation8 + $0xa8] sm:$0xff] }
  0x65   : > { %892 = vmatpush.msra.mxu2 %v1937_v13  ;;  %485 = vmatpush.msra.mxu0 %v476_v12  ;;  %v1967_v28 = vld [vmem:[#allocation8 + $0x130] sm:$0xff]  ;;  %v1973_v31 = vld [vmem:[#allocation8 + $0x128] sm:$0xff]  ;;  %v469_v33 = vld [vmem:[#allocation8 + $0xa0] sm:$0xff]  ;;  %p1637_p2 = pneg %p1636_p7 }
  0x66   : > { %655 = vmatpush.msra.mxu1 %v1940_v14  ;;  %1378 = vmatpush.msra.mxu3 %v475_v15  ;;  %v1970_v29 = vld [vmem:[#allocation8 + $0x30] sm:$0xff]  ;;  %v1976_v32 = vld [vmem:[#allocation8 + $0x28] sm:$0xff]  ;;  %v1979_v34 = vld [vmem:[#allocation8 + $0x120] sm:$0xff] }
  0x67   : > { %893 = vmatpush.msra.mxu2 %v1943_v16  ;;  %486 = vmatpush.msra.mxu0 %v475_v15  ;;  %v1982_v35 = vld [vmem:[#allocation8 + $0x20] sm:$0xff]  ;;  %v468_v36 = vld [vmem:[#allocation8 + $0x98] sm:$0xff]  ;;  %v467_v39 = vld [vmem:[#allocation8 + $0x90] sm:$0xff] }
  0x68   : > { %656 = vmatpush.msra.mxu1 %v1946_v17  ;;  %1379 = vmatpush.msra.mxu3 %v474_v18  ;;  %v1985_v37 = vld [vmem:[#allocation8 + $0x118] sm:$0xff]  ;;  %v1991_v40 = vld [vmem:[#allocation8 + $0x110] sm:$0xff]  ;;  %v466_v42 = vld [vmem:[#allocation8 + $0x88] sm:$0xff] }
  0x69   : > { %894 = vmatpush.msra.mxu2 %v1949_v19  ;;  %487 = vmatpush.msra.mxu0 %v474_v18  ;;  %v1988_v38 = vld [vmem:[#allocation8 + $0x18] sm:$0xff]  ;;  %v1994_v41 = vld [vmem:[#allocation8 + $0x10] sm:$0xff]  ;;  %v1997_v43 = vld [vmem:[#allocation8 + $0x108] sm:$0xff] }
  0x6a   : > { %657 = vmatpush.msra.mxu1 %v1952_v20  ;;  %1380 = vmatpush.msra.mxu3 %v473_v21  ;;  %v2000_v44 = vld [vmem:[#allocation8 + $0x8] sm:$0xff]  ;;  %v465_v45 = vld [vmem:[#allocation8 + $0x80] sm:$0xff]  ;;  %v453_v47 = vld [vmem:[%s1902_s12 + $0x138] sm:$0xff] }
  0x6b   : > { %895 = vmatpush.msra.mxu2 %v1955_v22  ;;  %488 = vmatpush.msra.mxu0 %v473_v21  ;;  %v2003_v46 = vld [vmem:[#allocation8 + $0x100] sm:$0xff]  ;;  %v821_v48 = vld [vmem:[%s1909_s6] sm:$0xff]  ;;  %v822_v53 = vld [vmem:[%s1909_s6 + $0x8] sm:$0xff] }
  0x6c   : > { %658 = vmatpush.msra.mxu1 %v1958_v23  ;;  %1381 = vmatpush.msra.mxu3 %v472_v24  ;;  %v398_v49 = vld [vmem:[#allocation8] sm:$0xff]  ;;  %v347_v51 = vld [vmem:[%s1894_s23] sm:$0xff]  ;;  %v348_v55 = vld [vmem:[%s1894_s23 + $0x8] sm:$0xff] }
  0x6d   : > { %896 = vmatpush.msra.mxu2 %v1961_v25  ;;  %489 = vmatpush.msra.mxu0 %v472_v24  ;;  %v414_v50 = vld [vmem:[%s1902_s12] sm:$0xff]  ;;  %v415_v54 = vld [vmem:[%s1902_s12 + $0x8] sm:$0xff]  ;;  %v416_v58 = vld [vmem:[%s1902_s12 + $0x10] sm:$0xff] }
  0x6e   : > { %659 = vmatpush.msra.mxu1 %v1964_v26  ;;  %1382 = vmatpush.msra.mxu3 %v471_v27  ;;  %v454_v52 = vld [vmem:[%s1902_s12 + $0x140] sm:$0xff]  ;;  %v455_v56 = vld [vmem:[%s1902_s12 + $0x148] sm:$0xff]  ;;  %v456_v60 = vld [vmem:[%s1902_s12 + $0x150] sm:$0xff] }
  0x6f   : > { %897 = vmatpush.msra.mxu2 %v1967_v28  ;;  %490 = vmatpush.msra.mxu0 %v471_v27  ;;  %v823_v57 = vld [vmem:[%s1909_s6 + $0x10] sm:$0xff]  ;;  %v824_v61 = vld [vmem:[%s1909_s6 + $0x18] sm:$0xff]  ;;  %v417_v62 = vld [vmem:[%s1902_s12 + $0x18] sm:$0xff] }
  0x70   : > { %660 = vmatpush.msra.mxu1 %v1970_v29  ;;  %1383 = vmatpush.msra.mxu3 %v470_v30  ;;  %v349_v59 = vld [vmem:[%s1894_s23 + $0x10] sm:$0xff]  ;;  %v350_v63 = vld [vmem:[%s1894_s23 + $0x18] sm:$0xff]  ;;  %v457_v0 = vld [vmem:[%s1902_s12 + $0x158] sm:$0xff] }
  0x71   : > { %898 = vmatpush.msra.mxu2 %v1973_v31  ;;  %491 = vmatpush.msra.mxu0 %v470_v30  ;;  %v825_v2 = vld [vmem:[%s1909_s6 + $0x20] sm:$0xff]  ;;  %v419_v9 = vld [vmem:[%s1902_s12 + $0x28] sm:$0xff]  ;;  %v827_v12 = vld [vmem:[%s1909_s6 + $0x30] sm:$0xff] }
  0x72   : > { %661 = vmatpush.msra.mxu1 %v1976_v32  ;;  %1384 = vmatpush.msra.mxu3 %v469_v33  ;;  %v351_v5 = vld [vmem:[%s1894_s23 + $0x20] sm:$0xff]  ;;  %v354_v15 = vld [vmem:[%s1894_s23 + $0x38] sm:$0xff]  ;;  %v422_v18 = vld [vmem:[%s1902_s12 + $0x40] sm:$0xff] }
  0x73   : > { %899 = vmatpush.msra.mxu2 %v1979_v34  ;;  %492 = vmatpush.msra.mxu0 %v469_v33  ;;  %v830_v21 = vld [vmem:[%s1909_s6 + $0x48] sm:$0xff]  ;;  %v463_v24 = vld [vmem:[%s1902_s12 + $0x188] sm:$0xff]  ;;  %v357_v27 = vld [vmem:[%s1894_s23 + $0x50] sm:$0xff] }
  0x74   : > { %662 = vmatpush.msra.mxu1 %v1982_v35  ;;  %1385 = vmatpush.msra.mxu3 %v468_v36  ;;  %v425_v30 = vld [vmem:[%s1902_s12 + $0x58] sm:$0xff]  ;;  %v833_v33 = vld [vmem:[%s1909_s6 + $0x60] sm:$0xff] }
  0x75   : > { %900 = vmatpush.msra.mxu2 %v1985_v37  ;;  %493 = vmatpush.msra.mxu0 %v468_v36  ;;  %v387_v36 = vld [vmem:[%s1894_s23 + $0x140] sm:$0xff] }
  0x76   : > { %663 = vmatpush.msra.mxu1 %v1988_v38  ;;  %1386 = vmatpush.msra.mxu3 %v467_v39 }
  0x77   : > { %901 = vmatpush.msra.mxu2 %v1991_v40  ;;  %494 = vmatpush.msra.mxu0 %v467_v39  ;;  %v360_v39 = vld [vmem:[%s1894_s23 + $0x68] sm:$0xff] }
  0x78   : > { %664 = vmatpush.msra.mxu1 %v1994_v41  ;;  %1387 = vmatpush.msra.mxu3 %v466_v42 }
  0x79   : > { %902 = vmatpush.msra.mxu2 %v1997_v43  ;;  %495 = vmatpush.msra.mxu0 %v466_v42  ;;  %v428_v42 = vld [vmem:[%s1902_s12 + $0x70] sm:$0xff] }
  0x7a   : > { %665 = vmatpush.msra.mxu1 %v2000_v44  ;;  %1388 = vmatpush.msra.mxu3 %v465_v45 }
  0x7b   : > { %903 = vmatpush.msra.mxu2 %v2003_v46  ;;  %614 = vmatmul.f32.vlgmr.msra.gmra.mxu3 %v453_v47  ;;  %v362_v47 = vld [vmem:[%s1894_s23 + $0x78] sm:$0xff] }
  0x7c   : > { %904 = vmatmul.f32.vlgmr.msra.gmra.mxu2 %v821_v48  ;;  %496 = vmatpush.msra.mxu0 %v465_v45  ;;  %v836_v45 = vld [vmem:[%s1909_s6 + $0x78] sm:$0xff] }
  0x7d   : > { %666 = vmatpush.msra.mxu1 %v398_v49  ;;  %497 = vmatmul.f32.vlgmr.msra.gmra.mxu0 %v414_v50  ;;  %v390_v48 = vld [vmem:[%s1894_s23 + $0x158] sm:$0xff] }
  0x7e   : > { %667 = vmatmul.f32.vlgmr.msra.gmra.mxu1 %v347_v51  ;;  %1389 = vmatpush.msrb.mxu3 %v1920_v4  ;;  %v418_v4 = vld [vmem:[%s1902_s12 + $0x20] sm:$0xff] }
  0x80   : > { %1390 = vmatpush.msrb.mxu3 %v1925_v7  ;;  %v458_v7 = vld [vmem:[%s1902_s12 + $0x160] sm:$0xff] }
  0x82   : > { %1391 = vmatpush.msrb.mxu3 %v1928_v8  ;;  %v826_v8 = vld [vmem:[%s1909_s6 + $0x28] sm:$0xff] }
  0x83   : > { %617 = vmatmul.f32.gmra.mxu3 %v454_v52  ;;  %v430_v52 = vld [vmem:[%s1902_s12 + $0x80] sm:$0xff] }
  0x84   : > { %907 = vmatmul.f32.gmra.mxu2 %v822_v53  ;;  %1392 = vmatpush.msrb.mxu3 %v1934_v11  ;;  %v352_v11 = vld [vmem:[%s1894_s23 + $0x28] sm:$0xff]  ;;  %v363_v53 = vld [vmem:[%s1894_s23 + $0x80] sm:$0xff] }
  0x85   : > { %500 = vmatmul.f32.gmra.mxu0 %v415_v54 }
  0x86   : > { %670 = vmatmul.f32.gmra.mxu1 %v348_v55  ;;  %1393 = vmatpush.msrb.mxu3 %v1940_v14  ;;  %v353_v14 = vld [vmem:[%s1894_s23 + $0x30] sm:$0xff]  ;;  %v2110_v55 = vld [vmem:[%s2411_s4] ss:$0 sm:$0xff] }
  0x88   : > { %1394 = vmatpush.msrb.mxu3 %v1946_v17  ;;  %v829_v17 = vld [vmem:[%s1909_s6 + $0x40] sm:$0xff] }
  0x8a   : > { %1395 = vmatpush.msrb.mxu3 %v1952_v20  ;;  %v462_v20 = vld [vmem:[%s1902_s12 + $0x180] sm:$0xff] }
  0x8b   : > { %620 = vmatmul.f32.gmra.mxu3 %v455_v56 }
  0x8c   : > { %910 = vmatmul.f32.gmra.mxu2 %v823_v57  ;;  %1396 = vmatpush.msrb.mxu3 %v1958_v23  ;;  %v356_v23 = vld [vmem:[%s1894_s23 + $0x48] sm:$0xff] }
  0x8d   : > { %503 = vmatmul.f32.gmra.mxu0 %v416_v58 }
  0x8e   : > { %673 = vmatmul.f32.gmra.mxu1 %v349_v59  ;;  %1397 = vmatpush.msrb.mxu3 %v1964_v26  ;;  %v424_v26 = vld [vmem:[%s1902_s12 + $0x50] sm:$0xff] }
  0x8f   : > { %v391_v59 = vld [vmem:[%s1894_s23 + $0x160] sm:$0xff] }
  0x90   : > { %1398 = vmatpush.msrb.mxu3 %v1970_v29  ;;  %v832_v29 = vld [vmem:[%s1909_s6 + $0x58] sm:$0xff] }
  0x92   : > { %1399 = vmatpush.msrb.mxu3 %v1976_v32  ;;  %v386_v32 = vld [vmem:[%s1894_s23 + $0x138] sm:$0xff] }
  0x93   : > { %623 = vmatmul.f32.gmra.mxu3 %v456_v60  ;;  %v838_v60 = vld [vmem:[%s1909_s6 + $0x88] sm:$0xff] }
  0x94   : > { %913 = vmatmul.f32.gmra.mxu2 %v824_v61  ;;  %1400 = vmatpush.msrb.mxu3 %v1982_v35  ;;  %v359_v35 = vld [vmem:[%s1894_s23 + $0x60] sm:$0xff] }
  0x95   : > { %506 = vmatmul.f32.gmra.mxu0 %v417_v62 }
  0x96   : > { %676 = vmatmul.f32.gmra.mxu1 %v350_v63  ;;  %1401 = vmatpush.msrb.mxu3 %v1988_v38  ;;  %v427_v38 = vld [vmem:[%s1902_s12 + $0x68] sm:$0xff] }
  0x98   : > { %1402 = vmatpush.msrb.mxu3 %v1994_v41  ;;  %v835_v41 = vld [vmem:[%s1909_s6 + $0x70] sm:$0xff] }
  0x9a   : > { %1403 = vmatpush.msrb.mxu3 %v2000_v44  ;;  %v389_v44 = vld [vmem:[%s1894_s23 + $0x150] sm:$0xff] }
  0x9b   : > { %626 = vmatmul.f32.gmra.mxu3 %v457_v0  ;;  %v431_v0 = vld [vmem:[%s1902_s12 + $0x88] sm:$0xff] }
  0x9c   : > { %916 = vmatmul.f32.gmra.mxu2 %v825_v2  ;;  %1404 = vmatpush.msrb.mxu3 %v398_v49  ;;  %v837_v49 = vld [vmem:[%s1909_s6 + $0x80] sm:$0xff]  ;;  %v364_v2 = vld [vmem:[%s1894_s23 + $0x88] sm:$0xff] }
  0x9d   : > { %509 = vmatmul.f32.gmra.mxu0 %v418_v4 }
  0x9e   : > { %679 = vmatmul.f32.gmra.mxu1 %v351_v5  ;;  %1405 = vmatpush.msra.mxu3 %v1915_v1  ;;  %v459_v1 = vld [vmem:[%s1902_s12 + $0x168] sm:$0xff] }
  0xa0   : > { %1406 = vmatpush.msra.mxu3 %v1918_v3  ;;  %v420_v3 = vld [vmem:[%s1902_s12 + $0x30] sm:$0xff] }
  0xa2   : > { %1407 = vmatpush.msra.mxu3 %v1923_v6  ;;  %v460_v6 = vld [vmem:[%s1902_s12 + $0x170] sm:$0xff] }
  0xa3   : > { %629 = vmatmul.f32.gmra.mxu3 %v458_v7 }
  0xa4   : > { %919 = vmatmul.f32.gmra.mxu2 %v826_v8  ;;  %1408 = vmatpush.msra.mxu3 %v1931_v10  ;;  %v828_v10 = vld [vmem:[%s1909_s6 + $0x38] sm:$0xff] }
  0xa5   : > { %512 = vmatmul.f32.gmra.mxu0 %v419_v9  ;;  %v392_v9 = vld [vmem:[%s1894_s23 + $0x168] sm:$0xff] }
  0xa6   : > { %682 = vmatmul.f32.gmra.mxu1 %v352_v11  ;;  %1409 = vmatpush.msra.mxu3 %v1937_v13  ;;  %v421_v13 = vld [vmem:[%s1902_s12 + $0x38] sm:$0xff]  ;;  %v839_v11 = vld [vmem:[%s1909_s6 + $0x90] sm:$0xff] }
  0xa8   : > { %1410 = vmatpush.msra.mxu3 %v1943_v16  ;;  %v461_v16 = vld [vmem:[%s1902_s12 + $0x178] sm:$0xff] }
  0xaa   : > { %1411 = vmatpush.msra.mxu3 %v1949_v19  ;;  %v355_v19 = vld [vmem:[%s1894_s23 + $0x40] sm:$0xff] }
  0xab   : > { %632 = vmatmul.f32.gmra.mxu3 %v459_v1 }
  0xac   : > { %922 = vmatmul.f32.gmra.mxu2 %v827_v12  ;;  %1412 = vmatpush.msra.mxu3 %v1955_v22  ;;  %v423_v22 = vld [vmem:[%s1902_s12 + $0x48] sm:$0xff] }
  0xad   : > { %515 = vmatmul.f32.gmra.mxu0 %v420_v3 }
  0xae   : > { %685 = vmatmul.f32.gmra.mxu1 %v353_v14  ;;  %1413 = vmatpush.msra.mxu3 %v1961_v25  ;;  %v831_v25 = vld [vmem:[%s1909_s6 + $0x50] sm:$0xff]  ;;  %v432_v14 = vld [vmem:[%s1902_s12 + $0x90] sm:$0xff] }
  0xb0   : > { %1414 = vmatpush.msra.mxu3 %v1967_v28  ;;  %v464_v28 = vld [vmem:[%s1902_s12 + $0x190] sm:$0xff] }
  0xb2   : > { %1415 = vmatpush.msra.mxu3 %v1973_v31  ;;  %v358_v31 = vld [vmem:[%s1894_s23 + $0x58] sm:$0xff] }
  0xb3   : > { %635 = vmatmul.f32.gmra.mxu3 %v460_v6  ;;  %v365_v6 = vld [vmem:[%s1894_s23 + $0x90] sm:$0xff] }
  0xb4   : > { %925 = vmatmul.f32.gmra.mxu2 %v828_v10  ;;  %1416 = vmatpush.msra.mxu3 %v1979_v34  ;;  %v426_v34 = vld [vmem:[%s1902_s12 + $0x60] sm:$0xff] }
  0xb5   : > { %518 = vmatmul.f32.gmra.mxu0 %v421_v13 }
  0xb6   : > { %688 = vmatmul.f32.gmra.mxu1 %v354_v15  ;;  %1417 = vmatpush.msra.mxu3 %v1985_v37  ;;  %v834_v37 = vld [vmem:[%s1909_s6 + $0x68] sm:$0xff] }
  0xb8   : > { %1418 = vmatpush.msra.mxu3 %v1991_v40  ;;  %v388_v40 = vld [vmem:[%s1894_s23 + $0x148] sm:$0xff] }
  0xba   : > { %1419 = vmatpush.msra.mxu3 %v1997_v43  ;;  %v361_v43 = vld [vmem:[%s1894_s23 + $0x70] sm:$0xff] }
  0xbb   : > { %638 = vmatmul.f32.gmra.mxu3 %v461_v16 }
  0xbc   : > { %928 = vmatmul.f32.gmra.mxu2 %v829_v17  ;;  %1420 = vmatpush.msra.mxu3 %v2003_v46  ;;  %v429_v46 = vld [vmem:[%s1902_s12 + $0x78] sm:$0xff]  ;;  %v393_v17 = vld [vmem:[%s1894_s23 + $0x170] sm:$0xff] }
  0xbd   : > { %521 = vmatmul.f32.gmra.mxu0 %v422_v18  ;;  %v840_v18 = vld [vmem:[%s1909_s6 + $0x98] sm:$0xff] }
  0xbe   : > { %691 = vmatmul.f32.gmra.mxu1 %v355_v19 }
  0xc3   : > { %641 = vmatmul.f32.gmra.mxu3 %v462_v20 }
  0xc4   : > { %931 = vmatmul.f32.gmra.mxu2 %v830_v21 }
  0xc5   : > { %524 = vmatmul.f32.gmra.mxu0 %v423_v22  ;;  %v433_v22 = vld [vmem:[%s1902_s12 + $0x98] sm:$0xff] }
  0xc6   : > { %694 = vmatmul.f32.gmra.mxu1 %v356_v23  ;;  %v366_v23 = vld [vmem:[%s1894_s23 + $0x98] sm:$0xff] }
  0xcb   : > { %644 = vmatmul.f32.gmra.mxu3 %v463_v24 }
  0xcc   : > { %934 = vmatmul.f32.gmra.mxu2 %v831_v25 }
  0xcd   : > { %527 = vmatmul.f32.gmra.mxu0 %v424_v26 }
  0xce   : > { %697 = vmatmul.f32.gmra.mxu1 %v357_v27 }
  0xd3   : > { %647 = vmatmul.f32.gmra.mxu3 %v464_v28  ;;  %v394_v28 = vld [vmem:[%s1894_s23 + $0x178] sm:$0xff] }
  0xd4   : > { %937 = vmatmul.f32.gmra.mxu2 %v832_v29  ;;  %v841_v29 = vld [vmem:[%s1909_s6 + $0xa0] sm:$0xff] }
  0xd5   : > { %530 = vmatmul.f32.gmra.mxu0 %v425_v30 }
  0xd6   : > { %700 = vmatmul.f32.gmra.mxu1 %v358_v31 }
  0xdb   : > { %784 = vmatmul.f32.vlgmr.msrb.gmra.mxu3 %v386_v32 }
  0xdc   : > { %940 = vmatmul.f32.gmra.mxu2 %v833_v33  ;;  %v434_v33 = vld [vmem:[%s1902_s12 + $0xa0] sm:$0xff] }
  0xdd   : > { %533 = vmatmul.f32.gmra.mxu0 %v426_v34  ;;  %v367_v34 = vld [vmem:[%s1894_s23 + $0xa0] sm:$0xff] }
  0xde   : > { %703 = vmatmul.f32.gmra.mxu1 %v359_v35 }
  0xe3   : > { %787 = vmatmul.f32.gmra.mxu3 %v387_v36 }
  0xe4   : > { %943 = vmatmul.f32.gmra.mxu2 %v834_v37 }
  0xe5   : > { %536 = vmatmul.f32.gmra.mxu0 %v427_v38 }
  0xe6   : > { %706 = vmatmul.f32.gmra.mxu1 %v360_v39  ;;  %v395_v39 = vld [vmem:[%s1894_s23 + $0x180] sm:$0xff] }
  0xeb   : > { %790 = vmatmul.f32.gmra.mxu3 %v388_v40  ;;  %v842_v40 = vld [vmem:[%s1909_s6 + $0xa8] sm:$0xff] }
  0xec   : > { %946 = vmatmul.f32.gmra.mxu2 %v835_v41 }
  0xed   : > { %539 = vmatmul.f32.gmra.mxu0 %v428_v42 }
  0xee   : > { %709 = vmatmul.f32.gmra.mxu1 %v361_v43 }
  0xf3   : > { %793 = vmatmul.f32.gmra.mxu3 %v389_v44  ;;  %v435_v44 = vld [vmem:[%s1902_s12 + $0xa8] sm:$0xff] }
  0xf4   : > { %949 = vmatmul.f32.gmra.mxu2 %v836_v45  ;;  %v368_v45 = vld [vmem:[%s1894_s23 + $0xa8] sm:$0xff] }
  0xf5   : > { %542 = vmatmul.f32.gmra.mxu0 %v429_v46 }
  0xf6   : > { %712 = vmatmul.f32.gmra.mxu1 %v362_v47 }
  0xfa   : > { %v498_v50 = vpop.f32.mrf.mxu0 }
  0xfb   : > { %v668_v51 = vpop.f32.mrf.mxu1  ;;  %796 = vmatmul.f32.gmra.mxu3 %v390_v48 }
  0xfc   : > { %952 = vmatmul.f32.gmra.mxu2 %v837_v49  ;;  %v669_v54 = vadd.f32 %v668_v51, %v498_v50  ;;  %v396_v50 = vld [vmem:[%s1894_s23 + $0x188] sm:$0xff]  ;;  %v843_v51 = vld [vmem:[%s1909_s6 + $0xb0] sm:$0xff] }
  0xfd   : > { %545 = vmatmul.f32.gmra.mxu0 %v430_v52 }
  0xfe   : > { %715 = vmatmul.f32.gmra.mxu1 %v363_v53  ;;  %v2112_v56 = vpop.f32.mrf.mxu3 }
  0xff   : > { %v905_v57 = vpop.f32.mrf.mxu2 }
 0x100   : > { %v1058_v58 = vadd.f32 %v905_v57, %v669_v54  ;;  %v436_v57 = vld [vmem:[%s1902_s12 + $0xb0] sm:$0xff] }
 0x102   : > { %v1113_v61 = vadd.f32 %v2110_v55, %v1058_v58  ;;  %v501_v62 = vpop.f32.mrf.mxu0  ;;  %v369_v58 = vld [vmem:[%s1894_s23 + $0xb0] sm:$0xff] }
 0x103   : > { %v671_v63 = vpop.f32.mrf.mxu1  ;;  %799 = vmatmul.f32.gmra.mxu3 %v391_v59 }
 0x104   : > { %1164 = vst [vmem:[%s2120_s17] sm:$0xff] %v1113_v61  ;;  %955 = vmatmul.f32.gmra.mxu2 %v838_v60  ;;  %v672_v4 = vadd.f32 %v671_v63, %v501_v62  ;;  %v397_v63 = vld [vmem:[%s1894_s23 + $0x190] sm:$0xff] }
 0x105   : > { %548 = vmatmul.f32.gmra.mxu0 %v431_v0  ;;  %v844_v0 = vld [vmem:[%s1909_s6 + $0xb8] sm:$0xff] }
 0x106   : > { %718 = vmatmul.f32.gmra.mxu1 %v364_v2  ;;  %v2123_v5 = vpop.f32.mrf.mxu3 }
 0x107   : > { %v908_v7 = vpop.f32.mrf.mxu2 }
 0x108   : > { %v1059_v8 = vadd.f32 %v908_v7, %v672_v4 }
 0x10a   : > { %v1114_v1 = vadd.f32 %v2110_v55, %v1059_v8  ;;  %v504_v12 = vpop.f32.mrf.mxu0  ;;  %v437_v8 = vld [vmem:[%s1902_s12 + $0xb8] sm:$0xff] }
 0x10b   : > { %v674_v3 = vpop.f32.mrf.mxu1  ;;  %802 = vmatmul.f32.gmra.mxu3 %v392_v9  ;;  %v370_v9 = vld [vmem:[%s1894_s23 + $0xb8] sm:$0xff] }
 0x10c   : > { %1165 = vst [vmem:[%s2120_s17 + $0x8] sm:$0xff] %v1114_v1  ;;  %958 = vmatmul.f32.gmra.mxu2 %v839_v11  ;;  %v675_v10 = vadd.f32 %v674_v3, %v504_v12 }
 0x10d   : > { %551 = vmatmul.f32.gmra.mxu0 %v432_v14  ;;  %v845_v14 = vld [vmem:[%s1909_s6 + $0xc0] sm:$0xff] }
 0x10e   : > { %721 = vmatmul.f32.gmra.mxu1 %v365_v6  ;;  %v2131_v13 = vpop.f32.mrf.mxu3  ;;  %v860_v6 = vld [vmem:[%s1909_s6 + $0x138] sm:$0xff] }
 0x10f   : > { %v911_v15 = vpop.f32.mrf.mxu2 }
 0x110   : > { %v1060_v16 = vadd.f32 %v911_v15, %v675_v10 }
 0x112   : > { %v1115_v19 = vadd.f32 %v2110_v55, %v1060_v16  ;;  %v507_v20 = vpop.f32.mrf.mxu0 }
 0x113   : > { %v677_v21 = vpop.f32.mrf.mxu1  ;;  %805 = vmatmul.f32.gmra.mxu3 %v393_v17  ;;  %v438_v17 = vld [vmem:[%s1902_s12 + $0xc0] sm:$0xff] }
 0x114   : > { %1166 = vst [vmem:[%s2120_s17 + $0x10] sm:$0xff] %v1115_v19  ;;  %961 = vmatmul.f32.gmra.mxu2 %v840_v18  ;;  %v678_v24 = vadd.f32 %v677_v21, %v507_v20  ;;  %v371_v18 = vld [vmem:[%s1894_s23 + $0xc0] sm:$0xff] }
 0x115   : > { %554 = vmatmul.f32.gmra.mxu0 %v433_v22 }
 0x116   : > { %724 = vmatmul.f32.gmra.mxu1 %v366_v23  ;;  %v2139_v25 = vpop.f32.mrf.mxu3  ;;  %v846_v23 = vld [vmem:[%s1909_s6 + $0xc8] sm:$0xff] }
 0x117   : > { %v914_v26 = vpop.f32.mrf.mxu2 }
 0x118   : > { %v1061_v27 = vadd.f32 %v914_v26, %v678_v24  ;;  %v861_v24 = vld [vmem:[%s1909_s6 + $0x140] sm:$0xff] }
 0x11a   : > { %v1116_v30 = vadd.f32 %v2110_v55, %v1061_v27  ;;  %v510_v31 = vpop.f32.mrf.mxu0 }
 0x11b   : > { %v680_v32 = vpop.f32.mrf.mxu1  ;;  %808 = vmatmul.f32.gmra.mxu3 %v394_v28 }
 0x11c   : > { %1167 = vst [vmem:[%s2120_s17 + $0x18] sm:$0xff] %v1116_v30  ;;  %964 = vmatmul.f32.gmra.mxu2 %v841_v29  ;;  %v681_v35 = vadd.f32 %v680_v32, %v510_v31  ;;  %v439_v29 = vld [vmem:[%s1902_s12 + $0xc8] sm:$0xff]  ;;  %v372_v30 = vld [vmem:[%s1894_s23 + $0xc8] sm:$0xff] }
 0x11d   : > { %557 = vmatmul.f32.gmra.mxu0 %v434_v33 }
 0x11e   : > { %727 = vmatmul.f32.gmra.mxu1 %v367_v34  ;;  %v2147_v36 = vpop.f32.mrf.mxu3 }
 0x11f   : > { %v917_v37 = vpop.f32.mrf.mxu2 }
 0x120   : > { %v1062_v38 = vadd.f32 %v917_v37, %v681_v35  ;;  %v847_v35 = vld [vmem:[%s1909_s6 + $0xd0] sm:$0xff]  ;;  %v862_v37 = vld [vmem:[%s1909_s6 + $0x148] sm:$0xff] }
 0x122   : > { %v1117_v41 = vadd.f32 %v2110_v55, %v1062_v38  ;;  %v513_v42 = vpop.f32.mrf.mxu0 }
 0x123   : > { %v683_v43 = vpop.f32.mrf.mxu1  ;;  %811 = vmatmul.f32.gmra.mxu3 %v395_v39 }
 0x124   : > { %1168 = vst [vmem:[%s2120_s17 + $0x20] sm:$0xff] %v1117_v41  ;;  %967 = vmatmul.f32.gmra.mxu2 %v842_v40  ;;  %v684_v46 = vadd.f32 %v683_v43, %v513_v42  ;;  %v440_v41 = vld [vmem:[%s1902_s12 + $0xd0] sm:$0xff]  ;;  %v373_v42 = vld [vmem:[%s1894_s23 + $0xd0] sm:$0xff] }
 0x125   : > { %560 = vmatmul.f32.gmra.mxu0 %v435_v44 }
 0x126   : > { %730 = vmatmul.f32.gmra.mxu1 %v368_v45  ;;  %v2155_v47 = vpop.f32.mrf.mxu3 }
 0x127   : > { %v920_v48 = vpop.f32.mrf.mxu2 }
 0x128   : > { %v1063_v49 = vadd.f32 %v920_v48, %v684_v46  ;;  %v848_v48 = vld [vmem:[%s1909_s6 + $0xd8] sm:$0xff] }
 0x12a   : > { %v1118_v52 = vadd.f32 %v2110_v55, %v1063_v49  ;;  %v516_v53 = vpop.f32.mrf.mxu0  ;;  %v863_v49 = vld [vmem:[%s1909_s6 + $0x150] sm:$0xff] }
 0x12b   : > { %v686_v54 = vpop.f32.mrf.mxu1  ;;  %814 = vmatmul.f32.gmra.mxu3 %v396_v50 }
 0x12c   : > { %1169 = vst [vmem:[%s2120_s17 + $0x28] sm:$0xff] %v1118_v52  ;;  %970 = vmatmul.f32.gmra.mxu2 %v843_v51  ;;  %v687_v59 = vadd.f32 %v686_v54, %v516_v53  ;;  %v441_v53 = vld [vmem:[%s1902_s12 + $0xd8] sm:$0xff]  ;;  %v374_v54 = vld [vmem:[%s1894_s23 + $0xd8] sm:$0xff] }
 0x12d   : > { %563 = vmatmul.f32.gmra.mxu0 %v436_v57 }
 0x12e   : > { %733 = vmatmul.f32.gmra.mxu1 %v369_v58  ;;  %v2163_v60 = vpop.f32.mrf.mxu3 }
 0x12f   : > { %v923_v61 = vpop.f32.mrf.mxu2 }
 0x130   : > { %v1064_v62 = vadd.f32 %v923_v61, %v687_v59 }
 0x132   : > { %v1119_v2 = vadd.f32 %v2110_v55, %v1064_v62  ;;  %v519_v4 = vpop.f32.mrf.mxu0  ;;  %v849_v62 = vld [vmem:[%s1909_s6 + $0xe0] sm:$0xff] }
 0x133   : > { %v689_v7 = vpop.f32.mrf.mxu1  ;;  %817 = vmatmul.f32.gmra.mxu3 %v397_v63  ;;  %v864_v63 = vld [vmem:[%s1909_s6 + $0x158] sm:$0xff] }
 0x134   : > { %1170 = vst [vmem:[%s2120_s17 + $0x30] sm:$0xff] %v1119_v2  ;;  %973 = vmatmul.f32.gmra.mxu2 %v844_v0  ;;  %v690_v11 = vadd.f32 %v689_v7, %v519_v4  ;;  %v442_v7 = vld [vmem:[%s1902_s12 + $0xe0] sm:$0xff] }
 0x135   : > { %566 = vmatmul.f32.gmra.mxu0 %v437_v8  ;;  %v375_v8 = vld [vmem:[%s1894_s23 + $0xe0] sm:$0xff] }
 0x136   : > { %736 = vmatmul.f32.gmra.mxu1 %v370_v9  ;;  %v2171_v1 = vpop.f32.mrf.mxu3 }
 0x137   : > { %v926_v12 = vpop.f32.mrf.mxu2 }
 0x138   : > { %v1065_v3 = vadd.f32 %v926_v12, %v690_v11 }
 0x13a   : > { %v1120_v10 = vadd.f32 %v2110_v55, %v1065_v3  ;;  %v522_v15 = vpop.f32.mrf.mxu0 }
 0x13b   : > { %v692_v16 = vpop.f32.mrf.mxu1  ;;  %1021 = vmatmul.f32.vlgmr.msra.gmra.mxu3 %v860_v6  ;;  %v865_v6 = vld [vmem:[%s1909_s6 + $0x160] sm:$0xff] }
 0x13c   : > { %1171 = vst [vmem:[%s2120_s17 + $0x38] sm:$0xff] %v1120_v10  ;;  %976 = vmatmul.f32.gmra.mxu2 %v845_v14  ;;  %v693_v19 = vadd.f32 %v692_v16, %v522_v15  ;;  %v850_v14 = vld [vmem:[%s1909_s6 + $0xe8] sm:$0xff] }
 0x13d   : > { %569 = vmatmul.f32.gmra.mxu0 %v438_v17  ;;  %v443_v17 = vld [vmem:[%s1902_s12 + $0xe8] sm:$0xff] }
 0x13e   : > { %739 = vmatmul.f32.gmra.mxu1 %v371_v18  ;;  %v2179_v20 = vpop.f32.mrf.mxu3  ;;  %v376_v18 = vld [vmem:[%s1894_s23 + $0xe8] sm:$0xff] }
 0x13f   : > { %v929_v21 = vpop.f32.mrf.mxu2 }
 0x140   : > { %v1066_v22 = vadd.f32 %v929_v21, %v693_v19 }
 0x142   : > { %v1121_v26 = vadd.f32 %v2110_v55, %v1066_v22  ;;  %v525_v27 = vpop.f32.mrf.mxu0 }
 0x143   : > { %v695_v28 = vpop.f32.mrf.mxu1  ;;  %1024 = vmatmul.f32.gmra.mxu3 %v861_v24  ;;  %v851_v24 = vld [vmem:[%s1909_s6 + $0xf0] sm:$0xff] }
 0x144   : > { %1172 = vst [vmem:[%s2120_s17 + $0x40] sm:$0xff] %v1121_v26  ;;  %979 = vmatmul.f32.gmra.mxu2 %v846_v23  ;;  %v696_v31 = vadd.f32 %v695_v28, %v525_v27  ;;  %v866_v26 = vld [vmem:[%s1909_s6 + $0x168] sm:$0xff] }
 0x145   : > { %572 = vmatmul.f32.gmra.mxu0 %v439_v29 }
 0x146   : > { %742 = vmatmul.f32.gmra.mxu1 %v372_v30  ;;  %v2187_v32 = vpop.f32.mrf.mxu3  ;;  %v444_v30 = vld [vmem:[%s1902_s12 + $0xf0] sm:$0xff] }
 0x147   : > { %v932_v33 = vpop.f32.mrf.mxu2 }
 0x148   : > { %v1067_v34 = vadd.f32 %v932_v33, %v696_v31  ;;  %v377_v31 = vld [vmem:[%s1894_s23 + $0xf0] sm:$0xff] }
 0x14a   : > { %v1122_v38 = vadd.f32 %v2110_v55, %v1067_v34  ;;  %v528_v39 = vpop.f32.mrf.mxu0 }
 0x14b   : > { %v698_v40 = vpop.f32.mrf.mxu1  ;;  %1027 = vmatmul.f32.gmra.mxu3 %v862_v37 }
 0x14c   : > { %1173 = vst [vmem:[%s2120_s17 + $0x48] sm:$0xff] %v1122_v38  ;;  %982 = vmatmul.f32.gmra.mxu2 %v847_v35  ;;  %v699_v43 = vadd.f32 %v698_v40, %v528_v39  ;;  %v852_v38 = vld [vmem:[%s1909_s6 + $0xf8] sm:$0xff]  ;;  %v867_v39 = vld [vmem:[%s1909_s6 + $0x170] sm:$0xff] }
 0x14d   : > { %575 = vmatmul.f32.gmra.mxu0 %v440_v41 }
 0x14e   : > { %745 = vmatmul.f32.gmra.mxu1 %v373_v42  ;;  %v2195_v44 = vpop.f32.mrf.mxu3 }
 0x14f   : > { %v935_v45 = vpop.f32.mrf.mxu2 }
 0x150   : > { %v1068_v46 = vadd.f32 %v935_v45, %v699_v43  ;;  %v445_v43 = vld [vmem:[%s1902_s12 + $0xf8] sm:$0xff]  ;;  %v378_v45 = vld [vmem:[%s1894_s23 + $0xf8] sm:$0xff] }
 0x152   : > { %v1123_v50 = vadd.f32 %v2110_v55, %v1068_v46  ;;  %v531_v51 = vpop.f32.mrf.mxu0 }
 0x153   : > { %v701_v52 = vpop.f32.mrf.mxu1  ;;  %1030 = vmatmul.f32.gmra.mxu3 %v863_v49 }
 0x154   : > { %1174 = vst [vmem:[%s2120_s17 + $0x50] sm:$0xff] %v1123_v50  ;;  %985 = vmatmul.f32.gmra.mxu2 %v848_v48  ;;  %v702_v57 = vadd.f32 %v701_v52, %v531_v51  ;;  %v853_v51 = vld [vmem:[%s1909_s6 + $0x100] sm:$0xff]  ;;  %v868_v52 = vld [vmem:[%s1909_s6 + $0x178] sm:$0xff] }
 0x155   : > { %578 = vmatmul.f32.gmra.mxu0 %v441_v53 }
 0x156   : > { %748 = vmatmul.f32.gmra.mxu1 %v374_v54  ;;  %v2203_v58 = vpop.f32.mrf.mxu3 }
 0x157   : > { %v938_v59 = vpop.f32.mrf.mxu2 }
 0x158   : > { %v1069_v61 = vadd.f32 %v938_v59, %v702_v57  ;;  %v446_v59 = vld [vmem:[%s1902_s12 + $0x100] sm:$0xff] }
 0x15a   : > { %v1124_v0 = vadd.f32 %v2110_v55, %v1069_v61  ;;  %v534_v2 = vpop.f32.mrf.mxu0  ;;  %v379_v61 = vld [vmem:[%s1894_s23 + $0x100] sm:$0xff] }
 0x15b   : > { %v704_v4 = vpop.f32.mrf.mxu1  ;;  %1033 = vmatmul.f32.gmra.mxu3 %v864_v63 }
 0x15c   : > { %1175 = vst [vmem:[%s2120_s17 + $0x58] sm:$0xff] %v1124_v0  ;;  %988 = vmatmul.f32.gmra.mxu2 %v849_v62  ;;  %v705_v9 = vadd.f32 %v704_v4, %v534_v2  ;;  %v854_v4 = vld [vmem:[%s1909_s6 + $0x108] sm:$0xff] }
 0x15d   : > { %581 = vmatmul.f32.gmra.mxu0 %v442_v7  ;;  %v869_v7 = vld [vmem:[%s1909_s6 + $0x180] sm:$0xff] }
 0x15e   : > { %751 = vmatmul.f32.gmra.mxu1 %v375_v8  ;;  %v2211_v11 = vpop.f32.mrf.mxu3 }
 0x15f   : > { %v941_v12 = vpop.f32.mrf.mxu2 }
 0x160   : > { %v1070_v3 = vadd.f32 %v941_v12, %v705_v9 }
 0x162   : > { %v1125_v10 = vadd.f32 %v2110_v55, %v1070_v3  ;;  %v537_v15 = vpop.f32.mrf.mxu0  ;;  %v447_v3 = vld [vmem:[%s1902_s12 + $0x108] sm:$0xff] }
 0x163   : > { %v707_v16 = vpop.f32.mrf.mxu1  ;;  %1036 = vmatmul.f32.gmra.mxu3 %v865_v6 }
 0x164   : > { %1176 = vst [vmem:[%s2120_s17 + $0x60] sm:$0xff] %v1125_v10  ;;  %991 = vmatmul.f32.gmra.mxu2 %v850_v14  ;;  %v708_v19 = vadd.f32 %v707_v16, %v537_v15  ;;  %v380_v14 = vld [vmem:[%s1894_s23 + $0x108] sm:$0xff] }
 0x165   : > { %584 = vmatmul.f32.gmra.mxu0 %v443_v17  ;;  %v855_v17 = vld [vmem:[%s1909_s6 + $0x110] sm:$0xff] }
 0x166   : > { %754 = vmatmul.f32.gmra.mxu1 %v376_v18  ;;  %v2219_v21 = vpop.f32.mrf.mxu3  ;;  %v870_v18 = vld [vmem:[%s1909_s6 + $0x188] sm:$0xff] }
 0x167   : > { %v944_v22 = vpop.f32.mrf.mxu2 }
 0x168   : > { %v1071_v23 = vadd.f32 %v944_v22, %v708_v19 }
 0x16a   : > { %v1126_v27 = vadd.f32 %v2110_v55, %v1071_v23  ;;  %v540_v28 = vpop.f32.mrf.mxu0 }
 0x16b   : > { %v710_v29 = vpop.f32.mrf.mxu1  ;;  %1039 = vmatmul.f32.gmra.mxu3 %v866_v26  ;;  %v381_v26 = vld [vmem:[%s1894_s23 + $0x110] sm:$0xff] }
 0x16c   : > { %1177 = vst [vmem:[%s2120_s17 + $0x68] sm:$0xff] %v1126_v27  ;;  %994 = vmatmul.f32.gmra.mxu2 %v851_v24  ;;  %v711_v33 = vadd.f32 %v710_v29, %v540_v28  ;;  %v448_v24 = vld [vmem:[%s1902_s12 + $0x110] sm:$0xff] }
 0x16d   : > { %587 = vmatmul.f32.gmra.mxu0 %v444_v30 }
 0x16e   : > { %757 = vmatmul.f32.gmra.mxu1 %v377_v31  ;;  %v2227_v34 = vpop.f32.mrf.mxu3  ;;  %v856_v31 = vld [vmem:[%s1909_s6 + $0x118] sm:$0xff] }
 0x16f   : > { %v947_v35 = vpop.f32.mrf.mxu2 }
 0x170   : > { %v1072_v37 = vadd.f32 %v947_v35, %v711_v33  ;;  %v871_v33 = vld [vmem:[%s1909_s6 + $0x190] sm:$0xff] }
 0x172   : > { %v1127_v40 = vadd.f32 %v2110_v55, %v1072_v37  ;;  %v543_v41 = vpop.f32.mrf.mxu0 }
 0x173   : > { %v713_v42 = vpop.f32.mrf.mxu1  ;;  %1042 = vmatmul.f32.gmra.mxu3 %v867_v39  ;;  %v449_v39 = vld [vmem:[%s1902_s12 + $0x118] sm:$0xff] }
 0x174   : > { %1178 = vst [vmem:[%s2120_s17 + $0x70] sm:$0xff] %v1127_v40  ;;  %997 = vmatmul.f32.gmra.mxu2 %v852_v38  ;;  %v714_v46 = vadd.f32 %v713_v42, %v543_v41  ;;  %v382_v40 = vld [vmem:[%s1894_s23 + $0x118] sm:$0xff] }
 0x175   : > { %590 = vmatmul.f32.gmra.mxu0 %v445_v43 }
 0x176   : > { %760 = vmatmul.f32.gmra.mxu1 %v378_v45  ;;  %v2235_v48 = vpop.f32.mrf.mxu3 }
 0x177   : > { %v950_v49 = vpop.f32.mrf.mxu2 }
 0x178   : > { %v1073_v50 = vadd.f32 %v950_v49, %v714_v46  ;;  %v857_v46 = vld [vmem:[%s1909_s6 + $0x120] sm:$0xff] }
 0x17a   : > { %v1128_v53 = vadd.f32 %v2110_v55, %v1073_v50  ;;  %v546_v54 = vpop.f32.mrf.mxu0 }
 0x17b   : > { %v716_v57 = vpop.f32.mrf.mxu1  ;;  %1045 = vmatmul.f32.gmra.mxu3 %v868_v52  ;;  %v450_v52 = vld [vmem:[%s1902_s12 + $0x120] sm:$0xff] }
 0x17c   : > { %1179 = vst [vmem:[%s2120_s17 + $0x78] sm:$0xff] %v1128_v53  ;;  %1000 = vmatmul.f32.gmra.mxu2 %v853_v51  ;;  %v717_v62 = vadd.f32 %v716_v57, %v546_v54  ;;  %v383_v53 = vld [vmem:[%s1894_s23 + $0x120] sm:$0xff] }
 0x17d   : > { %593 = vmatmul.f32.gmra.mxu0 %v446_v59 }
 0x17e   : > { %763 = vmatmul.f32.gmra.mxu1 %v379_v61  ;;  %v2243_v63 = vpop.f32.mrf.mxu3 }
 0x17f   : > { %v953_v0 = vpop.f32.mrf.mxu2 }
 0x180   : > { %v1074_v2 = vadd.f32 %v953_v0, %v717_v62  ;;  %v858_v62 = vld [vmem:[%s1909_s6 + $0x128] sm:$0xff] }
 0x182   : > { %v1129_v8 = vadd.f32 %v2110_v55, %v1074_v2  ;;  %v549_v9 = vpop.f32.mrf.mxu0 }
 0x183   : > { %v719_v12 = vpop.f32.mrf.mxu1  ;;  %1048 = vmatmul.f32.gmra.mxu3 %v869_v7  ;;  %v451_v7 = vld [vmem:[%s1902_s12 + $0x128] sm:$0xff] }
 0x184   : > { %1180 = vst [vmem:[%s2120_s17 + $0x80] sm:$0xff] %v1129_v8  ;;  %1003 = vmatmul.f32.gmra.mxu2 %v854_v4  ;;  %v720_v6 = vadd.f32 %v719_v12, %v549_v9  ;;  %v384_v8 = vld [vmem:[%s1894_s23 + $0x128] sm:$0xff] }
 0x185   : > { %596 = vmatmul.f32.gmra.mxu0 %v447_v3 }
 0x186   : > { %766 = vmatmul.f32.gmra.mxu1 %v380_v14  ;;  %v2251_v10 = vpop.f32.mrf.mxu3 }
 0x187   : > { %v956_v15 = vpop.f32.mrf.mxu2 }
 0x188   : > { %v1075_v16 = vadd.f32 %v956_v15, %v720_v6  ;;  %v859_v6 = vld [vmem:[%s1909_s6 + $0x130] sm:$0xff] }
 0x18a   : > { %v1130_v19 = vadd.f32 %v2110_v55, %v1075_v16  ;;  %v552_v22 = vpop.f32.mrf.mxu0 }
 0x18b   : > { %v722_v23 = vpop.f32.mrf.mxu1  ;;  %1051 = vmatmul.f32.gmra.mxu3 %v870_v18  ;;  %v452_v18 = vld [vmem:[%s1902_s12 + $0x130] sm:$0xff] }
 0x18c   : > { %1181 = vst [vmem:[%s2120_s17 + $0x88] sm:$0xff] %v1130_v19  ;;  %1006 = vmatmul.f32.gmra.mxu2 %v855_v17  ;;  %v723_v27 = vadd.f32 %v722_v23, %v552_v22  ;;  %v385_v19 = vld [vmem:[%s1894_s23 + $0x130] sm:$0xff]  ;;  %s1638_s23 = scalar_lea.hbm %s2412_s5, 1224 }
 0x18d   : > { %599 = vmatmul.f32.gmra.mxu0 %v448_v24  ;;  %p1640_p12 = scmp.lt.s32.totalorder %s1638_s23, %s1634_s13 }
 0x18e   : > { %769 = vmatmul.f32.gmra.mxu1 %v381_v26  ;;  %v2259_v28 = vpop.f32.mrf.mxu3 }
 0x18f   : > { %v959_v29 = vpop.f32.mrf.mxu2  ;;  %p1641_p1 = por %p1640_p12, %p1639_p6 }
 0x190   : > { %v1076_v30 = vadd.f32 %v959_v29, %v723_v27 }
 0x191   : > { %p1642_p3 = pnand %p1641_p1, %p1637_p2 }
 0x192   : > { %v1131_v35 = vadd.f32 %v2110_v55, %v1076_v30  ;;  %v555_v37 = vpop.f32.mrf.mxu0 }
 0x193   : > { %v725_v38 = vpop.f32.mrf.mxu1  ;;  %1054 = vmatmul.f32.gmra.mxu3 %v871_v33 }
 0x194   : > { %1182 = vst [vmem:[%s2120_s17 + $0x90] sm:$0xff] %v1131_v35  ;;  %1009 = vmatmul.f32.gmra.mxu2 %v856_v31  ;;  %v726_v41 = vadd.f32 %v725_v38, %v555_v37 }
 0x195   : > { %602 = vmatmul.f32.gmra.mxu0 %v449_v39 }
 0x196   : > { %772 = vmatmul.f32.gmra.mxu1 %v382_v40  ;;  %v2267_v42 = vpop.f32.mrf.mxu3 }
 0x197   : > { %v962_v43 = vpop.f32.mrf.mxu2 }
 0x198   : > { %v1077_v45 = vadd.f32 %v962_v43, %v726_v41  ;;  %v786_v43 = vadd.f32 %v2211_v11, %v2112_v56 }
 0x19a   : > { %v1132_v49 = vadd.f32 %v2110_v55, %v1077_v45  ;;  %v558_v50 = vpop.f32.mrf.mxu0 }
 0x19b   : > { %v728_v51 = vpop.f32.mrf.mxu1 }
 0x19c   : > { %1183 = vst [vmem:[%s2120_s17 + $0x98] sm:$0xff] %v1132_v49  ;;  %1012 = vmatmul.f32.gmra.mxu2 %v857_v46  ;;  %v729_v54 = vadd.f32 %v728_v51, %v558_v50 }
 0x19d   : > { %605 = vmatmul.f32.gmra.mxu0 %v450_v52 }
 0x19e   : > { %775 = vmatmul.f32.gmra.mxu1 %v383_v53  ;;  %v2274_v57 = vpop.f32.mrf.mxu3 }
 0x19f   : > { %v965_v59 = vpop.f32.mrf.mxu2 }
 0x1a0   : > { %v1078_v61 = vadd.f32 %v965_v59, %v729_v54 }
 0x1a2   : > { %v1133_v0 = vadd.f32 %v2110_v55, %v1078_v61  ;;  %v561_v2 = vpop.f32.mrf.mxu0  ;;  %v789_v61 = vadd.f32 %v2219_v21, %v2123_v5 }
 0x1a3   : > { %v731_v4 = vpop.f32.mrf.mxu1 }
 0x1a4   : > { %1184 = vst [vmem:[%s2120_s17 + $0xa0] sm:$0xff] %v1133_v0  ;;  %1015 = vmatmul.f32.gmra.mxu2 %v858_v62  ;;  %v732_v9 = vadd.f32 %v731_v4, %v561_v2 }
 0x1a5   : > { %608 = vmatmul.f32.gmra.mxu0 %v451_v7 }
 0x1a6   : > { %778 = vmatmul.f32.gmra.mxu1 %v384_v8  ;;  %v2281_v12 = vpop.f32.mrf.mxu3 }
 0x1a7   : > { %v968_v3 = vpop.f32.mrf.mxu2 }
 0x1a8   : > { %v1079_v14 = vadd.f32 %v968_v3, %v732_v9  ;;  %v792_v3 = vadd.f32 %v2227_v34, %v2131_v13 }
 0x1aa   : > { %v1134_v15 = vadd.f32 %v2110_v55, %v1079_v14  ;;  %v564_v16 = vpop.f32.mrf.mxu0 }
 0x1ab   : > { %v734_v17 = vpop.f32.mrf.mxu1 }
 0x1ac   : > { %1185 = vst [vmem:[%s2120_s17 + $0xa8] sm:$0xff] %v1134_v15  ;;  %1018 = vmatmul.f32.gmra.mxu2 %v859_v6  ;;  %v735_v22 = vadd.f32 %v734_v17, %v564_v16 }
 0x1ad   : > { %611 = vmatmul.f32.gmra.mxu0 %v452_v18 }
 0x1ae   : > { %781 = vmatmul.f32.gmra.mxu1 %v385_v19  ;;  %v2288_v23 = vpop.f32.mrf.mxu3 }
 0x1af   : > { %v971_v24 = vpop.f32.mrf.mxu2 }
 0x1b0   : > { %v1080_v26 = vadd.f32 %v971_v24, %v735_v22  ;;  %v795_v22 = vadd.f32 %v2235_v48, %v2139_v25 }
 0x1b2   : > { %v1135_v27 = vadd.f32 %v2110_v55, %v1080_v26  ;;  %v567_v29 = vpop.f32.mrf.mxu0 }
 0x1b3   : > { %v737_v30 = vpop.f32.mrf.mxu1 }
 0x1b4   : > { %1186 = vst [vmem:[%s2120_s17 + $0xb0] sm:$0xff] %v1135_v27  ;;  %v738_v31 = vadd.f32 %v737_v30, %v567_v29 }
 0x1b6   : > { %v2292_v33 = vpop.f32.mrf.mxu3 }
 0x1b7   : > { %v974_v35 = vpop.f32.mrf.mxu2 }
 0x1b8   : > { %v1081_v37 = vadd.f32 %v974_v35, %v738_v31 }
 0x1ba   : > { %v1136_v38 = vadd.f32 %v2110_v55, %v1081_v37  ;;  %v570_v39 = vpop.f32.mrf.mxu0  ;;  %v798_v37 = vadd.f32 %v2243_v63, %v2147_v36 }
 0x1bb   : > { %v740_v40 = vpop.f32.mrf.mxu1 }
 0x1bc   : > { %1187 = vst [vmem:[%s2120_s17 + $0xb8] sm:$0xff] %v1136_v38  ;;  %v741_v41 = vadd.f32 %v740_v40, %v570_v39 }
 0x1be   : > { %v1022_v46 = vpop.f32.mrf.mxu3 }
 0x1bf   : > { %v977_v45 = vpop.f32.mrf.mxu2  ;;  %v1097_v50 = vadd.f32 %v1022_v46, %v786_v43 }
 0x1c0   : > { %v1082_v49 = vadd.f32 %v977_v45, %v741_v41 }
 0x1c1   : > { %v1152_v52 = vadd.f32 %v2110_v55, %v1097_v50 }
 0x1c2   : > { %v1137_v51 = vadd.f32 %v2110_v55, %v1082_v49  ;;  %v573_v53 = vpop.f32.mrf.mxu0  ;;  %v801_v49 = vadd.f32 %v2251_v10, %v2155_v47 }
 0x1c3   : > { %v743_v54 = vpop.f32.mrf.mxu1  ;;  %1203 = vst [vmem:[%s2120_s17 + $0x138] sm:$0xff] %v1152_v52 }
 0x1c4   : > { %1188 = vst [vmem:[%s2120_s17 + $0xc0] sm:$0xff] %v1137_v51  ;;  %v744_v59 = vadd.f32 %v743_v54, %v573_v53 }
 0x1c6   : > { %v1025_v56 = vpop.f32.mrf.mxu3 }
 0x1c7   : > { %v980_v62 = vpop.f32.mrf.mxu2  ;;  %v1098_v0 = vadd.f32 %v1025_v56, %v789_v61 }
 0x1c8   : > { %v1083_v11 = vadd.f32 %v980_v62, %v744_v59  ;;  %v804_v62 = vadd.f32 %v2259_v28, %v2163_v60 }
 0x1c9   : > { %v1153_v4 = vadd.f32 %v2110_v55, %v1098_v0 }
 0x1ca   : > { %v1138_v2 = vadd.f32 %v2110_v55, %v1083_v11  ;;  %v576_v7 = vpop.f32.mrf.mxu0 }
 0x1cb   : > { %v746_v8 = vpop.f32.mrf.mxu1  ;;  %1204 = vst [vmem:[%s2120_s17 + $0x140] sm:$0xff] %v1153_v4 }
 0x1cc   : > { %1189 = vst [vmem:[%s2120_s17 + $0xc8] sm:$0xff] %v1138_v2  ;;  %v747_v9 = vadd.f32 %v746_v8, %v576_v7 }
 0x1ce   : > { %v1028_v5 = vpop.f32.mrf.mxu3 }
 0x1cf   : > { %v983_v14 = vpop.f32.mrf.mxu2  ;;  %v1099_v6 = vadd.f32 %v1028_v5, %v792_v3 }
 0x1d0   : > { %v1084_v21 = vadd.f32 %v983_v14, %v747_v9  ;;  %v807_v9 = vadd.f32 %v2267_v42, %v2171_v1 }
 0x1d1   : > { %v1154_v16 = vadd.f32 %v2110_v55, %v1099_v6 }
 0x1d2   : > { %v1139_v15 = vadd.f32 %v2110_v55, %v1084_v21  ;;  %v579_v17 = vpop.f32.mrf.mxu0 }
 0x1d3   : > { %v749_v18 = vpop.f32.mrf.mxu1  ;;  %1205 = vst [vmem:[%s2120_s17 + $0x148] sm:$0xff] %v1154_v16 }
 0x1d4   : > { %1190 = vst [vmem:[%s2120_s17 + $0xd0] sm:$0xff] %v1139_v15  ;;  %v750_v19 = vadd.f32 %v749_v18, %v579_v17  ;;  %v810_v17 = vadd.f32 %v2274_v57, %v2179_v20 }
 0x1d6   : > { %v1031_v13 = vpop.f32.mrf.mxu3 }
 0x1d7   : > { %v986_v24 = vpop.f32.mrf.mxu2  ;;  %v1100_v26 = vadd.f32 %v1031_v13, %v795_v22 }
 0x1d8   : > { %v1085_v34 = vadd.f32 %v986_v24, %v750_v19 }
 0x1d9   : > { %v1155_v29 = vadd.f32 %v2110_v55, %v1100_v26 }
 0x1da   : > { %v1140_v27 = vadd.f32 %v2110_v55, %v1085_v34  ;;  %v582_v30 = vpop.f32.mrf.mxu0 }
 0x1db   : > { %v752_v31 = vpop.f32.mrf.mxu1  ;;  %1206 = vst [vmem:[%s2120_s17 + $0x150] sm:$0xff] %v1155_v29 }
 0x1dc   : > { %1191 = vst [vmem:[%s2120_s17 + $0xd8] sm:$0xff] %v1140_v27  ;;  %v753_v35 = vadd.f32 %v752_v31, %v582_v30  ;;  %v813_v27 = vadd.f32 %v2281_v12, %v2187_v32 }
 0x1de   : > { %v1034_v25 = vpop.f32.mrf.mxu3 }
 0x1df   : > { %v989_v38 = vpop.f32.mrf.mxu2  ;;  %v1101_v39 = vadd.f32 %v1034_v25, %v798_v37 }
 0x1e0   : > { %v1086_v48 = vadd.f32 %v989_v38, %v753_v35 }
 0x1e1   : > { %v1156_v41 = vadd.f32 %v2110_v55, %v1101_v39 }
 0x1e2   : > { %v1141_v40 = vadd.f32 %v2110_v55, %v1086_v48  ;;  %v585_v43 = vpop.f32.mrf.mxu0  ;;  %v816_v48 = vadd.f32 %v2288_v23, %v2195_v44 }
 0x1e3   : > { %v755_v45 = vpop.f32.mrf.mxu1  ;;  %1207 = vst [vmem:[%s2120_s17 + $0x158] sm:$0xff] %v1156_v41 }
 0x1e4   : > { %1192 = vst [vmem:[%s2120_s17 + $0xe0] sm:$0xff] %v1141_v40  ;;  %v756_v46 = vadd.f32 %v755_v45, %v585_v43 }
 0x1e6   : > { %v1037_v36 = vpop.f32.mrf.mxu3 }
 0x1e7   : > { %v992_v50 = vpop.f32.mrf.mxu2  ;;  %v1102_v51 = vadd.f32 %v1037_v36, %v801_v49 }
 0x1e8   : > { %v1087_v63 = vadd.f32 %v992_v50, %v756_v46  ;;  %v819_v50 = vadd.f32 %v2292_v33, %v2203_v58  ;;  %v1497_v58 = vld [vmem:[%s2411_s4] ss:$0 sm:$0xff] }
 0x1e9   : > { %v1157_v53 = vadd.f32 %v2110_v55, %v1102_v51 }
 0x1ea   : > { %v1142_v52 = vadd.f32 %v2110_v55, %v1087_v63  ;;  %v588_v54 = vpop.f32.mrf.mxu0 }
 0x1eb   : > { %v758_v59 = vpop.f32.mrf.mxu1  ;;  %1208 = vst [vmem:[%s2120_s17 + $0x160] sm:$0xff] %v1157_v53 }
 0x1ec   : > { %1193 = vst [vmem:[%s2120_s17 + $0xe8] sm:$0xff] %v1142_v52  ;;  %v759_v61 = vadd.f32 %v758_v59, %v588_v54 }
 0x1ee   : > { %v1040_v47 = vpop.f32.mrf.mxu3 }
 0x1ef   : > { %v995_v56 = vpop.f32.mrf.mxu2  ;;  %v1103_v11 = vadd.f32 %v1040_v47, %v804_v62 }
 0x1f0   : > { %v1088_v10 = vadd.f32 %v995_v56, %v759_v61 }
 0x1f1   : > { %v1158_v2 = vadd.f32 %v2110_v55, %v1103_v11 }
 0x1f2   : > { %v1143_v0 = vadd.f32 %v2110_v55, %v1088_v10  ;;  %v591_v4 = vpop.f32.mrf.mxu0 }
 0x1f3   : > { %v761_v7 = vpop.f32.mrf.mxu1  ;;  %1209 = vst [vmem:[%s2120_s17 + $0x168] sm:$0xff] %v1158_v2 }
 0x1f4   : > { %1194 = vst [vmem:[%s2120_s17 + $0xf0] sm:$0xff] %v1143_v0  ;;  %v762_v8 = vadd.f32 %v761_v7, %v591_v4 }
 0x1f6   : > { %v1043_v60 = vpop.f32.mrf.mxu3 }
 0x1f7   : > { %v998_v3 = vpop.f32.mrf.mxu2  ;;  %v1104_v14 = vadd.f32 %v1043_v60, %v807_v9 }
 0x1f8   : > { %v1089_v28 = vadd.f32 %v998_v3, %v762_v8 }
 0x1f9   : > { %v1159_v21 = vadd.f32 %v2110_v55, %v1104_v14 }
 0x1fa   : > { %v1144_v5 = vadd.f32 %v2110_v55, %v1089_v28  ;;  %v594_v6 = vpop.f32.mrf.mxu0 }
 0x1fb   : > { %v764_v15 = vpop.f32.mrf.mxu1  ;;  %1210 = vst [vmem:[%s2120_s17 + $0x170] sm:$0xff] %v1159_v21 }
 0x1fc   : > { %1195 = vst [vmem:[%s2120_s17 + $0xf8] sm:$0xff] %v1144_v5  ;;  %v765_v16 = vadd.f32 %v764_v15, %v594_v6 }
 0x1fe   : > { %v1046_v1 = vpop.f32.mrf.mxu3 }
 0x1ff   : > { %v1001_v18 = vpop.f32.mrf.mxu2  ;;  %v1105_v19 = vadd.f32 %v1046_v1, %v810_v17 }
 0x200   : > { %v1090_v42 = vadd.f32 %v1001_v18, %v765_v16 }
 0x201   : > { %v1160_v24 = vadd.f32 %v2110_v55, %v1105_v19 }
 0x202   : > { %v1145_v22 = vadd.f32 %v2110_v55, %v1090_v42  ;;  %v597_v13 = vpop.f32.mrf.mxu0 }
 0x203   : > { %v767_v34 = vpop.f32.mrf.mxu1  ;;  %1211 = vst [vmem:[%s2120_s17 + $0x178] sm:$0xff] %v1160_v24 }
 0x204   : > { %1196 = vst [vmem:[%s2120_s17 + $0x100] sm:$0xff] %v1145_v22  ;;  %v768_v26 = vadd.f32 %v767_v34, %v597_v13 }
 0x206   : > { %v1049_v20 = vpop.f32.mrf.mxu3 }
 0x207   : > { %v1004_v29 = vpop.f32.mrf.mxu2  ;;  %v1106_v30 = vadd.f32 %v1049_v20, %v813_v27 }
 0x208   : > { %v1091_v57 = vadd.f32 %v1004_v29, %v768_v26 }
 0x209   : > { %v1161_v35 = vadd.f32 %v2110_v55, %v1106_v30 }
 0x20a   : > { %v1146_v31 = vadd.f32 %v2110_v55, %v1091_v57  ;;  %v600_v37 = vpop.f32.mrf.mxu0 }
 0x20b   : > { %v770_v38 = vpop.f32.mrf.mxu1  ;;  %1212 = vst [vmem:[%s2120_s17 + $0x180] sm:$0xff] %v1161_v35 }
 0x20c   : > { %1197 = vst [vmem:[%s2120_s17 + $0x108] sm:$0xff] %v1146_v31  ;;  %v771_v25 = vadd.f32 %v770_v38, %v600_v37 }
 0x20e   : > { %v1052_v32 = vpop.f32.mrf.mxu3 }
 0x20f   : > { %v1007_v39 = vpop.f32.mrf.mxu2  ;;  %v1107_v40 = vadd.f32 %v1052_v32, %v816_v48 }
 0x210   : > { %v1092_v12 = vadd.f32 %v1007_v39, %v771_v25 }
 0x211   : > { %v1162_v43 = vadd.f32 %v2110_v55, %v1107_v40 }
 0x212   : > { %v1147_v41 = vadd.f32 %v2110_v55, %v1092_v12  ;;  %v603_v45 = vpop.f32.mrf.mxu0 }
 0x213   : > { %v773_v46 = vpop.f32.mrf.mxu1  ;;  %1213 = vst [vmem:[%s2120_s17 + $0x188] sm:$0xff] %v1162_v43 }
 0x214   : > { %1198 = vst [vmem:[%s2120_s17 + $0x110] sm:$0xff] %v1147_v41  ;;  %v774_v49 = vadd.f32 %v773_v46, %v603_v45 }
 0x216   : > { %v1055_v44 = vpop.f32.mrf.mxu3 }
 0x217   : > { %v1010_v36 = vpop.f32.mrf.mxu2  ;;  %v1108_v63 = vadd.f32 %v1055_v44, %v819_v50 }
 0x218   : > { %v1093_v23 = vadd.f32 %v1010_v36, %v774_v49 }
 0x219   : > { %v1163_v52 = vadd.f32 %v2110_v55, %v1108_v63 }
 0x21a   : > { %v1148_v51 = vadd.f32 %v2110_v55, %v1093_v23  ;;  %v606_v53 = vpop.f32.mrf.mxu0 }
 0x21b   : > { %v776_v54 = vpop.f32.mrf.mxu1  ;;  %1214 = vst [vmem:[%s2120_s17 + $0x190] sm:$0xff] %v1163_v52 }
 0x21c   : > { %1199 = vst [vmem:[%s2120_s17 + $0x118] sm:$0xff] %v1148_v51  ;;  %v777_v59 = vadd.f32 %v776_v54, %v606_v53 }
 0x21f   : > { %v1013_v61 = vpop.f32.mrf.mxu2 }
 0x220   : > { %v1094_v62 = vadd.f32 %v1013_v61, %v777_v59 }
 0x222   : > { %v1149_v33 = vadd.f32 %v1497_v58, %v1094_v62  ;;  %v609_v56 = vpop.f32.mrf.mxu0 }
 0x223   : > { %v779_v47 = vpop.f32.mrf.mxu1 }
 0x224   : > { %1200 = vst [vmem:[%s2120_s17 + $0x120] sm:$0xff] %v1149_v33  ;;  %v780_v10 = vadd.f32 %v779_v47, %v609_v56 }
 0x227   : > { %v1016_v11 = vpop.f32.mrf.mxu2 }
 0x228   : > { %v1095_v55 = vadd.f32 %v1016_v11, %v780_v10 }
 0x22a   : > { %v1150_v0 = vadd.f32 %v1497_v58, %v1095_v55  ;;  %v612_v2 = vpop.f32.mrf.mxu0 }
 0x22b   : > { %v782_v4 = vpop.f32.mrf.mxu1 }
 0x22c   : > { %1201 = vst [vmem:[%s2120_s17 + $0x128] sm:$0xff] %v1150_v0  ;;  %v783_v7 = vadd.f32 %v782_v4, %v612_v2 }
 0x22f   : > { %v1019_v8 = vpop.f32.mrf.mxu2 }
 0x230   : > { %v1096_v9 = vadd.f32 %v1019_v8, %v783_v7 }
 0x232   : > { %v1151_v3 = vadd.f32 %v1497_v58, %v1096_v9 }
 0x234   : > { %1202 = vst [vmem:[%s2120_s17 + $0x130] sm:$0xff] %v1151_v3 }
 0x235   : > { %1645 = shalt.err (!%p1642_p3)
}
 0x236   : > { %s1697_s27 = smov 128   ;;  %s1698_s12 = smov 8  }
 0x237   : > { %1435 = dma.vmem_to_hbm [thread:$0]  (%p1820_p9), %s1229_s14, 6528, %s1231_s3, %s1216_s7, %s1697_s27, %s1697_s27, %s1698_s12  }
 0x238 PF: > { %p1458_p4 = scmp.ge.s32.totalorder %s1692_s21, 2  ;;  %s1245_s10 = sand.u32 1, %s1680_s18  }
 0x239   : > { %s1246_s16 = scalar_lea.sflag [#allocation4], %s1245_s10 }
 0x23a   : > { %p1452_p8 = pnand %p1458_p4, %p1824_p10 }
 0x23c   : > { %p1453_p11 = pneg %p1452_p8 }
 0x23e   : > { %1675 = dma.done.wait (%p1453_p11), %s1246_s16, 6528  }
 0x23f   : > { %1677 = vsyncadd (%p1453_p11), %s1246_s16, 4294960768  ;;  %s2434_s21 = sld [smem:[#allocation15_spill]]  ;;  %s2436_s18 = smov %s1684_s19 }
 0x240   : > { %s2435_s17 = sld [smem:[#allocation16_spill]]  ;;  %s2437_s19 = smov %s1688_s20 }
 0x245   : > { %p22_p0 = scmp.ge.s32.totalorder %s2434_s21, 5  }
 0x246   : > { %s2438_s20 = smov %s2435_s17 }
 0x247   :  { %24 = sbr.rel (!%p22_p0) target bundleno = 11 (0xb), region = 113 }
 0x24c   :  { %1252 = vsyncpa [#allocation3], 1 }
 0x24d   :  { %1254 = vsyncpa [#allocation3 + $0x1], 1 }
 0x24e   :  { %1255 = vsyncpa [#allocation6], 1 }
 0x24f   :  { %1257 = vsyncpa [#allocation6 + $0x1], 1 }
 0x250   :  { %1258 = vsyncpa [#allocation9], 1 }
 0x251   :  { %1259 = vsyncpa [#allocation4], 1 }
 0x252   :  { %1261 = vsyncpa [#allocation4 + $0x1], 1 }

</bundles_post_ra>
